<compile_context>
chip_gen: v5e
topology: v5e:2x2
jax: 0.10.0
libtpu: 0.0.40
codegen_flags: <defaults>
</compile_context>

<pallas_src>
import math

import jax
import jax.numpy as jnp
from jax.experimental import pallas as pl
from jax.experimental.pallas import tpu as pltpu


def _round_up(x, m):
    return ((x + m - 1) // m) * m


# ----------------------------------------------------------------------------- kernel
def _make_kernel(n_layers, HP):
    def kernel(tok_ref, emb_ref, *refs):
        # tok_ref (SMEM) was already consumed by the embedding index_map.
        del tok_ref
        w_i_refs = refs[:n_layers]                       # (in_pad, 3*HP) each, weight dtype
        w_h_refs = refs[n_layers:2 * n_layers]           # (HP, 3*HP) each, weight dtype
        (gru_b_ref, h0_ref, enc_ref, encT_ref, attn_wT_ref,
         proj_wT_ref, proj_b_ref, logits_ref, hout_ref) = refs[2 * n_layers:]

        # Gathered embedding row, DMA'd by the pipeline prologue (hidden latency).
        x = emb_ref[0]                                   # (1, EP), weight dtype

        # ---- multi-layer GRU, single time step (fused gates, 128-lane aligned) ----
        for l in range(n_layers):
            wi = w_i_refs[l][...]
            wh = w_h_refs[l][...]
            h_prev = h0_ref[l:l + 1, :]                  # (1, HP) f32
            gi = jnp.dot(x.astype(wi.dtype), wi,
                         preferred_element_type=jnp.float32)        # (1, 3*HP)
            gh = jnp.dot(h_prev.astype(wh.dtype), wh,
                         preferred_element_type=jnp.float32)        # (1, 3*HP)
            b = gru_b_ref[l:l + 1, :]                    # (1, 4*HP) f32

            r = jax.nn.sigmoid(gi[:, 0:HP] + gh[:, 0:HP] + b[:, 0:HP])
            z = jax.nn.sigmoid(gi[:, HP:2 * HP] + gh[:, HP:2 * HP] + b[:, HP:2 * HP])
            n = jnp.tanh(gi[:, 2 * HP:3 * HP] + b[:, 2 * HP:3 * HP]
                         + r * (gh[:, 2 * HP:3 * HP] + b[:, 3 * HP:4 * HP]))
            h_new = (1.0 - z) * n + z * h_prev           # (1, HP) f32, padded lanes stay 0
            hout_ref[l:l + 1, :] = h_new                 # per-layer store
            x = h_new

        output = x                                       # (1, HP) f32

        # ---- attention over encoder hiddens ---------------------------------------
        aw = attn_wT_ref[...]
        ei = jnp.dot(output.astype(aw.dtype), aw,
                     preferred_element_type=jnp.float32)             # (1, HP)
        scores = jnp.dot(ei, encT_ref[...],
                         preferred_element_type=jnp.float32)         # (1, S)
        m = jnp.max(scores, axis=1, keepdims=True)
        e = jnp.exp(scores - m)
        eij = e / jnp.sum(e, axis=1, keepdims=True)                   # softmax over S
        ci = jnp.dot(eij, enc_ref[...],
                     preferred_element_type=jnp.float32)              # (1, HP)

        # ---- project(cat([ci, output])) — single fused, lane-dense matmul ---------
        pw = proj_wT_ref[...]
        cat = jnp.concatenate([ci, output], axis=1).astype(pw.dtype)  # (1, 2*HP)
        logits_ref[...] = (jnp.dot(cat, pw, preferred_element_type=jnp.float32)
                           + proj_b_ref[...])

    return kernel


# ----------------------------------------------------------------------------- prep (one-time)
def prepare_params(params, weight_dtype=jnp.float32):
    """One-time packing / padding / casting of AttnDecoder weights for the kernel."""
    V, E = params["embedding"].shape
    L = len(params["gru"])
    H = params["gru"][0]["w_hh"].shape[1]
    HP = _round_up(H, 128)
    EP = _round_up(E, 128)
    VP = _round_up(V, 128)

    emb = jnp.zeros((V, 1, EP), jnp.float32)
    emb = emb.at[:, 0, :E].set(params["embedding"]).astype(weight_dtype)

    w_i_list, w_h_list, b_rows = [], [], []
    for l in range(L):
        p = params["gru"][l]
        in_l = p["w_ih"].shape[1]
        in_pad = EP if l == 0 else HP
        w_ihT = p["w_ih"].T                               # (in_l, 3H), gates [r|z|n]
        w_hhT = p["w_hh"].T                               # (H, 3H)
        w_i = jnp.zeros((in_pad, 3 * HP), jnp.float32)
        w_h = jnp.zeros((HP, 3 * HP), jnp.float32)
        for g in range(3):
            w_i = w_i.at[:in_l, g * HP:g * HP + H].set(w_ihT[:, g * H:(g + 1) * H])
            w_h = w_h.at[:H, g * HP:g * HP + H].set(w_hhT[:, g * H:(g + 1) * H])
        w_i_list.append(w_i.astype(weight_dtype))
        w_h_list.append(w_h.astype(weight_dtype))

        b_ir, b_iz, b_in_ = jnp.split(p["b_ih"], 3)
        b_hr, b_hz, b_hn = jnp.split(p["b_hh"], 3)
        b = jnp.zeros((4 * HP,), jnp.float32)
        b = b.at[0 * HP:0 * HP + H].set(b_ir + b_hr)
        b = b.at[1 * HP:1 * HP + H].set(b_iz + b_hz)
        b = b.at[2 * HP:2 * HP + H].set(b_in_)
        b = b.at[3 * HP:3 * HP + H].set(b_hn)
        b_rows.append(b)
    gru_b = jnp.stack(b_rows, 0)                          # (L, 4*HP) f32, one gate / 128 lanes

    attn_wT = jnp.zeros((HP, HP), jnp.float32)
    attn_wT = attn_wT.at[:H, :H].set(params["attn_w"].T).astype(weight_dtype)

    proj_w = params["proj_w"]                             # (V, 2H); cols [ci | output]
    proj_wT = jnp.zeros((2 * HP, VP), jnp.float32)
    proj_wT = proj_wT.at[:H, :V].set(proj_w[:, :H].T)
    proj_wT = proj_wT.at[HP:HP + H, :V].set(proj_w[:, H:2 * H].T)
    proj_wT = proj_wT.astype(weight_dtype)
    proj_b = jnp.zeros((1, VP), jnp.float32).at[0, :V].set(params["proj_b"])

    return dict(emb=emb, w_i=tuple(w_i_list), w_h=tuple(w_h_list), gru_b=gru_b,
                attn_wT=attn_wT, proj_wT=proj_wT, proj_b=proj_b,
                dims=dict(V=V, E=E, H=H, L=L, HP=HP, EP=EP, VP=VP))


def prepare_encoder(encoder_hiddens, HP):
    """Once per source sentence: padded enc and its transpose (no in-kernel transpose)."""
    S, H = encoder_hiddens.shape[1], encoder_hiddens.shape[2]
    enc = jnp.zeros((S, HP), jnp.float32)
    enc = enc.at[:, :H].set(encoder_hiddens.reshape(S, H).astype(jnp.float32))
    return enc, enc.T                                     # (S, HP), (HP, S)


# ----------------------------------------------------------------------------- per-step wrapper
def attn_decoder_step(prep, enc, encT, token, hidden):
    """token: (1,1) int32; hidden: (L,1,H) f32 -> (logits (1,1,V), hidden (L,1,H))."""
    d = prep["dims"]
    L, H, HP, EP, VP, V = d["L"], d["H"], d["HP"], d["EP"], d["VP"], d["V"]

    tok = token.reshape(1).astype(jnp.int32)
    h0 = jnp.zeros((L, HP), jnp.float32)
    h0 = h0.at[:, :H].set(hidden.reshape(L, H).astype(jnp.float32))

    inputs = [prep["emb"], *prep["w_i"], *prep["w_h"], prep["gru_b"], h0,
              enc, encT, prep["attn_wT"], prep["proj_wT"], prep["proj_b"]]

    def full_spec(arr):
        nd = arr.ndim
        return pl.BlockSpec(arr.shape, lambda *_: (0,) * nd)

    # Data-dependent row gather: token id drives the embedding block index, so the
    # (1,1,EP) row is fetched by the pipeline prologue (latency hidden).
    emb_spec = pl.BlockSpec((1, 1, EP), lambda i, tok_ref: (tok_ref[0], 0, 0))
    in_specs = [emb_spec] + [full_spec(a) for a in inputs[1:]]
    out_specs = (pl.BlockSpec((1, VP), lambda i, tok_ref: (0, 0)),
                 pl.BlockSpec((L, HP), lambda i, tok_ref: (0, 0)))

    logits, h_new = pl.pallas_call(
        _make_kernel(L, HP),
        out_shape=(jax.ShapeDtypeStruct((1, VP), jnp.float32),
                   jax.ShapeDtypeStruct((L, HP), jnp.float32)),
        grid_spec=pltpu.PrefetchScalarGridSpec(
            num_scalar_prefetch=1,
            grid=(1,),
            in_specs=in_specs,
            out_specs=out_specs,
        ),
        compiler_params=pltpu.CompilerParams(dimension_semantics=("arbitrary",)),
    )(tok, *inputs)

    return logits[:, :V].reshape(1, 1, V), h_new[:, :H].reshape(L, 1, H)


# ----------------------------------------------------------------------------- reference & test
def reference_forward(params, token, hidden, encoder_hiddens):
    """Pure-JAX mirror of the PyTorch forward (eval mode), for checking."""
    H = hidden.shape[-1]
    x = params["embedding"][token.reshape(())][None, :]
    new_h = []
    for l, p in enumerate(params["gru"]):
        h = hidden[l, 0][None, :]
        gi = x @ p["w_ih"].T + p["b_ih"]
        gh = h @ p["w_hh"].T + p["b_hh"]
        r = jax.nn.sigmoid(gi[:, :H] + gh[:, :H])
        z = jax.nn.sigmoid(gi[:, H:2 * H] + gh[:, H:2 * H])
        n = jnp.tanh(gi[:, 2 * H:] + r * gh[:, 2 * H:])
        h = (1.0 - z) * n + z * h
        new_h.append(h)
        x = h
    output = x
    enc = encoder_hiddens[0]
    ei = output @ params["attn_w"].T
    eij = jax.nn.softmax(ei @ enc.T, axis=1)
    ci = eij @ enc
    cat = jnp.concatenate([ci, output], axis=1)
    logits = cat @ params["proj_w"].T + params["proj_b"]
    return logits.reshape(1, 1, -1), jnp.stack(new_h, 0).reshape(len(new_h), 1, H)


def round_weights_to_bf16(params):
    """bf16-round the weight matrices (not biases), for checking the bf16 path."""
    def rnd(x):
        return x.astype(jnp.bfloat16).astype(jnp.float32)
    p = dict(params)
    p["embedding"] = rnd(params["embedding"])
    p["gru"] = [dict(w_ih=rnd(g["w_ih"]), w_hh=rnd(g["w_hh"]),
                     b_ih=g["b_ih"], b_hh=g["b_hh"]) for g in params["gru"]]
    p["attn_w"] = rnd(params["attn_w"])
    p["proj_w"] = rnd(params["proj_w"])
    return p


def init_params(key, V, E, H, L):
    ks = list(jax.random.split(key, 4 * L + 4))
    it = iter(ks)

    def u(k, shape, scale):
        return jax.random.uniform(k, shape, jnp.float32, -scale, scale)

    s = 1.0 / math.sqrt(H)
    params = {"embedding": jax.random.normal(next(it), (V, E), jnp.float32)}
    gru = []
    for l in range(L):
        in_size = E if l == 0 else H
        gru.append(dict(
            w_ih=u(next(it), (3 * H, in_size), s),
            w_hh=u(next(it), (3 * H, H), s),
            b_ih=u(next(it), (3 * H,), s),
            b_hh=u(next(it), (3 * H,), s),
        ))
    params["gru"] = gru
    params["attn_w"] = u(next(it), (H, H), s)
    sp = 1.0 / math.sqrt(2 * H)
    params["proj_w"] = u(next(it), (V, 2 * H), sp)
    params["proj_b"] = u(next(it), (V,), sp)
    return params


if __name__ == "__main__":
    V, E, H, L, S = 64, 32, 32, 2, 8  # l_dict_ch, embedding_ch_size, hidden_units, n_layers, src len

    key = jax.random.PRNGKey(0)
    kp, kh, ke = jax.random.split(key, 3)
    params = init_params(kp, V, E, H, L)

    token = jnp.array([[3]], dtype=jnp.int32)                              # (1, 1)
    hidden = 0.1 * jax.random.normal(kh, (L, 1, H), jnp.float32)           # (L, 1, H)
    encoder_hiddens = 0.1 * jax.random.normal(ke, (1, S, H), jnp.float32)  # (1, S, H)

    # ---- f32 weights: exact-semantics check ------------------------------------
    prep_f32 = prepare_params(params, weight_dtype=jnp.float32)            # one-time
    enc, encT = prepare_encoder(encoder_hiddens, prep_f32["dims"]["HP"])   # once per sentence
    logits, h_new = attn_decoder_step(prep_f32, enc, encT, token, hidden)
    jax.block_until_ready((logits, h_new))

    ref_logits, ref_h = reference_forward(params, token, hidden, encoder_hiddens)
    assert logits.shape == (1, 1, V) and h_new.shape == (L, 1, H)
    assert jnp.allclose(logits, ref_logits, rtol=1e-4, atol=1e-4)
    assert jnp.allclose(h_new, ref_h, rtol=1e-4, atol=1e-4)

    # ---- bf16-stored weights fed to the MXU directly (bf16 x bf16, f32 accum) ---
    # Activations are cast to bf16 only at the MXU inputs, so compare against the
    # bf16-rounded-weights f32 reference with a correspondingly looser tolerance.
    prep_bf16 = prepare_params(params, weight_dtype=jnp.bfloat16)
    logits_bf, h_new_bf = attn_decoder_step(prep_bf16, enc, encT, token, hidden)
    jax.block_until_ready((logits_bf, h_new_bf))
    ref_logits_bf, ref_h_bf = reference_forward(
        round_weights_to_bf16(params), token, hidden, encoder_hiddens)
    assert jnp.allclose(logits_bf, ref_logits_bf, rtol=2e-2, atol=2e-2)
    assert jnp.allclose(h_new_bf, ref_h_bf, rtol=2e-2, atol=2e-2)

    print("KERNEL_OK")
</pallas_src>

<mosaic_0001>
module attributes {stable_mosaic.version = 11 : i64} {
  func.func @kernel(%arg0: i32, %arg1: memref<1xi32, #tpu.memory_space<smem>>, %arg2: memref<1x1x128xf32, #tpu.memory_space<vmem>>, %arg3: memref<128x384xf32, #tpu.memory_space<vmem>>, %arg4: memref<128x384xf32, #tpu.memory_space<vmem>>, %arg5: memref<128x384xf32, #tpu.memory_space<vmem>>, %arg6: memref<128x384xf32, #tpu.memory_space<vmem>>, %arg7: memref<2x512xf32, #tpu.memory_space<vmem>>, %arg8: memref<2x128xf32, #tpu.memory_space<vmem>>, %arg9: memref<8x128xf32, #tpu.memory_space<vmem>>, %arg10: memref<128x8xf32, #tpu.memory_space<vmem>>, %arg11: memref<128x128xf32, #tpu.memory_space<vmem>>, %arg12: memref<256x128xf32, #tpu.memory_space<vmem>>, %arg13: memref<1x128xf32, #tpu.memory_space<vmem>>, %arg14: memref<1x128xf32, #tpu.memory_space<vmem>>, %arg15: memref<2x128xf32, #tpu.memory_space<vmem>>) attributes {dimension_semantics = [#tpu.dimension_semantics<arbitrary>], iteration_bounds = array<i64: 1>, scalar_prefetch = 1 : i64, scratch_operands = 0 : i64, tpu.core_type = #tpu.core_type<tc>, window_params = [{transform_indices = @transform_0, window_bounds = array<i64: 1, 1, 128>}, {pipeline_mode = #tpu.pipeline_mode<synchronous>, transform_indices = @transform_1, window_bounds = array<i64: 128, 384>}, {pipeline_mode = #tpu.pipeline_mode<synchronous>, transform_indices = @transform_2, window_bounds = array<i64: 128, 384>}, {pipeline_mode = #tpu.pipeline_mode<synchronous>, transform_indices = @transform_3, window_bounds = array<i64: 128, 384>}, {pipeline_mode = #tpu.pipeline_mode<synchronous>, transform_indices = @transform_4, window_bounds = array<i64: 128, 384>}, {pipeline_mode = #tpu.pipeline_mode<synchronous>, transform_indices = @transform_5, window_bounds = array<i64: 2, 512>}, {pipeline_mode = #tpu.pipeline_mode<synchronous>, transform_indices = @transform_6, window_bounds = array<i64: 2, 128>}, {pipeline_mode = #tpu.pipeline_mode<synchronous>, transform_indices = @transform_7, window_bounds = array<i64: 8, 128>}, {pipeline_mode = #tpu.pipeline_mode<synchronous>, transform_indices = @transform_8, window_bounds = array<i64: 128, 8>}, {pipeline_mode = #tpu.pipeline_mode<synchronous>, transform_indices = @transform_9, window_bounds = array<i64: 128, 128>}, {pipeline_mode = #tpu.pipeline_mode<synchronous>, transform_indices = @transform_10, window_bounds = array<i64: 256, 128>}, {pipeline_mode = #tpu.pipeline_mode<synchronous>, transform_indices = @transform_11, window_bounds = array<i64: 1, 128>}, {pipeline_mode = #tpu.pipeline_mode<synchronous>, transform_indices = @transform_12, window_bounds = array<i64: 1, 128>}, {pipeline_mode = #tpu.pipeline_mode<synchronous>, transform_indices = @transform_13, window_bounds = array<i64: 2, 128>}]} {
    %c0 = arith.constant 0 : index
    %c0_0 = arith.constant 0 : index
    %c0_1 = arith.constant 0 : index
    %0 = vector.load %arg2[%c0, %c0_0, %c0_1] : memref<1x1x128xf32, #tpu.memory_space<vmem>>, vector<1x1x128xf32>
    %1 = vector.shape_cast %0 : vector<1x1x128xf32> to vector<1x128xf32>
    %c0_2 = arith.constant 0 : index
    %c0_3 = arith.constant 0 : index
    %2 = vector.load %arg3[%c0_2, %c0_3] : memref<128x384xf32, #tpu.memory_space<vmem>>, vector<128x384xf32>
    %c0_4 = arith.constant 0 : index
    %c0_5 = arith.constant 0 : index
    %3 = vector.load %arg5[%c0_4, %c0_5] : memref<128x384xf32, #tpu.memory_space<vmem>>, vector<128x384xf32>
    %c0_6 = arith.constant 0 : index
    %c0_7 = arith.constant 0 : index
    %4 = vector.load %arg8[%c0_6, %c0_7] : memref<2x128xf32, #tpu.memory_space<vmem>>, vector<1x128xf32>
    %cst = arith.constant dense<0.000000e+00> : vector<1x384xf32>
    %5 = tpu.matmul %1, %2, %cst {dimension_numbers = #tpu.dot_dimension_numbers<[1], [0], [0], [1], [0, 0, 1, 1], [], []>} : vector<1x128xf32>, vector<128x384xf32>, vector<1x384xf32> -> vector<1x384xf32>
    %cst_8 = arith.constant dense<0.000000e+00> : vector<1x384xf32>
    %6 = tpu.matmul %4, %3, %cst_8 {dimension_numbers = #tpu.dot_dimension_numbers<[1], [0], [0], [1], [0, 0, 1, 1], [], []>} : vector<1x128xf32>, vector<128x384xf32>, vector<1x384xf32> -> vector<1x384xf32>
    %c0_9 = arith.constant 0 : index
    %c0_10 = arith.constant 0 : index
    %7 = vector.load %arg7[%c0_9, %c0_10] : memref<2x512xf32, #tpu.memory_space<vmem>>, vector<1x512xf32>
    %8 = vector.extract_strided_slice %5 {offsets = [0, 0], sizes = [1, 128], strides = [1, 1]} : vector<1x384xf32> to vector<1x128xf32>
    %9 = vector.extract_strided_slice %6 {offsets = [0, 0], sizes = [1, 128], strides = [1, 1]} : vector<1x384xf32> to vector<1x128xf32>
    %10 = arith.addf %8, %9 : vector<1x128xf32>
    %11 = vector.extract_strided_slice %7 {offsets = [0, 0], sizes = [1, 128], strides = [1, 1]} : vector<1x512xf32> to vector<1x128xf32>
    %12 = arith.addf %10, %11 : vector<1x128xf32>
    %13 = arith.negf %12 : vector<1x128xf32>
    %14 = math.exp %13 : vector<1x128xf32>
    %cst_11 = arith.constant 1.000000e+00 : f32
    %15 = vector.broadcast %cst_11 : f32 to vector<1x128xf32>
    %16 = arith.addf %15, %14 : vector<1x128xf32>
    %17 = arith.divf %15, %16 : vector<1x128xf32>
    %18 = vector.extract_strided_slice %5 {offsets = [0, 128], sizes = [1, 128], strides = [1, 1]} : vector<1x384xf32> to vector<1x128xf32>
    %19 = vector.extract_strided_slice %6 {offsets = [0, 128], sizes = [1, 128], strides = [1, 1]} : vector<1x384xf32> to vector<1x128xf32>
    %20 = arith.addf %18, %19 : vector<1x128xf32>
    %21 = vector.extract_strided_slice %7 {offsets = [0, 128], sizes = [1, 128], strides = [1, 1]} : vector<1x512xf32> to vector<1x128xf32>
    %22 = arith.addf %20, %21 : vector<1x128xf32>
    %23 = arith.negf %22 : vector<1x128xf32>
    %24 = math.exp %23 : vector<1x128xf32>
    %cst_12 = arith.constant 1.000000e+00 : f32
    %25 = vector.broadcast %cst_12 : f32 to vector<1x128xf32>
    %26 = arith.addf %25, %24 : vector<1x128xf32>
    %27 = arith.divf %25, %26 : vector<1x128xf32>
    %28 = vector.extract_strided_slice %5 {offsets = [0, 256], sizes = [1, 128], strides = [1, 1]} : vector<1x384xf32> to vector<1x128xf32>
    %29 = vector.extract_strided_slice %7 {offsets = [0, 256], sizes = [1, 128], strides = [1, 1]} : vector<1x512xf32> to vector<1x128xf32>
    %30 = arith.addf %28, %29 : vector<1x128xf32>
    %31 = vector.extract_strided_slice %6 {offsets = [0, 256], sizes = [1, 128], strides = [1, 1]} : vector<1x384xf32> to vector<1x128xf32>
    %32 = vector.extract_strided_slice %7 {offsets = [0, 384], sizes = [1, 128], strides = [1, 1]} : vector<1x512xf32> to vector<1x128xf32>
    %33 = arith.addf %31, %32 : vector<1x128xf32>
    %34 = arith.mulf %17, %33 : vector<1x128xf32>
    %35 = arith.addf %30, %34 : vector<1x128xf32>
    %36 = math.tanh %35 : vector<1x128xf32>
    %cst_13 = arith.constant 1.000000e+00 : f32
    %37 = vector.broadcast %cst_13 : f32 to vector<1x128xf32>
    %38 = arith.subf %37, %27 : vector<1x128xf32>
    %39 = arith.mulf %38, %36 : vector<1x128xf32>
    %40 = arith.mulf %27, %4 : vector<1x128xf32>
    %41 = arith.addf %39, %40 : vector<1x128xf32>
    %c0_14 = arith.constant 0 : index
    %c0_15 = arith.constant 0 : index
    %42 = vector.load %arg15[%c0_14, %c0_15] : memref<2x128xf32, #tpu.memory_space<vmem>>, vector<1x128xf32>
    tpu.vector_store %arg15[%c0_14, %c0_15], %41 {strides = array<i32>} : memref<2x128xf32, #tpu.memory_space<vmem>>, vector<1x128xf32>,
    %c0_16 = arith.constant 0 : index
    %c0_17 = arith.constant 0 : index
    %43 = vector.load %arg4[%c0_16, %c0_17] : memref<128x384xf32, #tpu.memory_space<vmem>>, vector<128x384xf32>
    %c0_18 = arith.constant 0 : index
    %c0_19 = arith.constant 0 : index
    %44 = vector.load %arg6[%c0_18, %c0_19] : memref<128x384xf32, #tpu.memory_space<vmem>>, vector<128x384xf32>
    %c1 = arith.constant 1 : index
    %c0_20 = arith.constant 0 : index
    %45 = vector.load %arg8[%c1, %c0_20] : memref<2x128xf32, #tpu.memory_space<vmem>>, vector<1x128xf32>
    %cst_21 = arith.constant dense<0.000000e+00> : vector<1x384xf32>
    %46 = tpu.matmul %41, %43, %cst_21 {dimension_numbers = #tpu.dot_dimension_numbers<[1], [0], [0], [1], [0, 0, 1, 1], [], []>} : vector<1x128xf32>, vector<128x384xf32>, vector<1x384xf32> -> vector<1x384xf32>
    %cst_22 = arith.constant dense<0.000000e+00> : vector<1x384xf32>
    %47 = tpu.matmul %45, %44, %cst_22 {dimension_numbers = #tpu.dot_dimension_numbers<[1], [0], [0], [1], [0, 0, 1, 1], [], []>} : vector<1x128xf32>, vector<128x384xf32>, vector<1x384xf32> -> vector<1x384xf32>
    %c1_23 = arith.constant 1 : index
    %c0_24 = arith.constant 0 : index
    %48 = vector.load %arg7[%c1_23, %c0_24] : memref<2x512xf32, #tpu.memory_space<vmem>>, vector<1x512xf32>
    %49 = vector.extract_strided_slice %46 {offsets = [0, 0], sizes = [1, 128], strides = [1, 1]} : vector<1x384xf32> to vector<1x128xf32>
    %50 = vector.extract_strided_slice %47 {offsets = [0, 0], sizes = [1, 128], strides = [1, 1]} : vector<1x384xf32> to vector<1x128xf32>
    %51 = arith.addf %49, %50 : vector<1x128xf32>
    %52 = vector.extract_strided_slice %48 {offsets = [0, 0], sizes = [1, 128], strides = [1, 1]} : vector<1x512xf32> to vector<1x128xf32>
    %53 = arith.addf %51, %52 : vector<1x128xf32>
    %54 = arith.negf %53 : vector<1x128xf32>
    %55 = math.exp %54 : vector<1x128xf32>
    %cst_25 = arith.constant 1.000000e+00 : f32
    %56 = vector.broadcast %cst_25 : f32 to vector<1x128xf32>
    %57 = arith.addf %56, %55 : vector<1x128xf32>
    %58 = arith.divf %56, %57 : vector<1x128xf32>
    %59 = vector.extract_strided_slice %46 {offsets = [0, 128], sizes = [1, 128], strides = [1, 1]} : vector<1x384xf32> to vector<1x128xf32>
    %60 = vector.extract_strided_slice %47 {offsets = [0, 128], sizes = [1, 128], strides = [1, 1]} : vector<1x384xf32> to vector<1x128xf32>
    %61 = arith.addf %59, %60 : vector<1x128xf32>
    %62 = vector.extract_strided_slice %48 {offsets = [0, 128], sizes = [1, 128], strides = [1, 1]} : vector<1x512xf32> to vector<1x128xf32>
    %63 = arith.addf %61, %62 : vector<1x128xf32>
    %64 = arith.negf %63 : vector<1x128xf32>
    %65 = math.exp %64 : vector<1x128xf32>
    %cst_26 = arith.constant 1.000000e+00 : f32
    %66 = vector.broadcast %cst_26 : f32 to vector<1x128xf32>
    %67 = arith.addf %66, %65 : vector<1x128xf32>
    %68 = arith.divf %66, %67 : vector<1x128xf32>
    %69 = vector.extract_strided_slice %46 {offsets = [0, 256], sizes = [1, 128], strides = [1, 1]} : vector<1x384xf32> to vector<1x128xf32>
    %70 = vector.extract_strided_slice %48 {offsets = [0, 256], sizes = [1, 128], strides = [1, 1]} : vector<1x512xf32> to vector<1x128xf32>
    %71 = arith.addf %69, %70 : vector<1x128xf32>
    %72 = vector.extract_strided_slice %47 {offsets = [0, 256], sizes = [1, 128], strides = [1, 1]} : vector<1x384xf32> to vector<1x128xf32>
    %73 = vector.extract_strided_slice %48 {offsets = [0, 384], sizes = [1, 128], strides = [1, 1]} : vector<1x512xf32> to vector<1x128xf32>
    %74 = arith.addf %72, %73 : vector<1x128xf32>
    %75 = arith.mulf %58, %74 : vector<1x128xf32>
    %76 = arith.addf %71, %75 : vector<1x128xf32>
    %77 = math.tanh %76 : vector<1x128xf32>
    %cst_27 = arith.constant 1.000000e+00 : f32
    %78 = vector.broadcast %cst_27 : f32 to vector<1x128xf32>
    %79 = arith.subf %78, %68 : vector<1x128xf32>
    %80 = arith.mulf %79, %77 : vector<1x128xf32>
    %81 = arith.mulf %68, %45 : vector<1x128xf32>
    %82 = arith.addf %80, %81 : vector<1x128xf32>
    %c1_28 = arith.constant 1 : index
    %c0_29 = arith.constant 0 : index
    %83 = vector.load %arg15[%c1_28, %c0_29] : memref<2x128xf32, #tpu.memory_space<vmem>>, vector<1x128xf32>
    tpu.vector_store %arg15[%c1_28, %c0_29], %82 {strides = array<i32>} : memref<2x128xf32, #tpu.memory_space<vmem>>, vector<1x128xf32>,
    %c0_30 = arith.constant 0 : index
    %c0_31 = arith.constant 0 : index
    %84 = vector.load %arg11[%c0_30, %c0_31] : memref<128x128xf32, #tpu.memory_space<vmem>>, vector<128x128xf32>
    %cst_32 = arith.constant dense<0.000000e+00> : vector<1x128xf32>
    %85 = tpu.matmul %82, %84, %cst_32 {dimension_numbers = #tpu.dot_dimension_numbers<[1], [0], [0], [1], [0, 0, 1, 1], [], []>} : vector<1x128xf32>, vector<128x128xf32>, vector<1x128xf32> -> vector<1x128xf32>
    %c0_33 = arith.constant 0 : index
    %c0_34 = arith.constant 0 : index
    %86 = vector.load %arg10[%c0_33, %c0_34] : memref<128x8xf32, #tpu.memory_space<vmem>>, vector<128x8xf32>
    %cst_35 = arith.constant dense<0.000000e+00> : vector<1x8xf32>
    %87 = tpu.matmul %85, %86, %cst_35 {dimension_numbers = #tpu.dot_dimension_numbers<[1], [0], [0], [1], [0, 0, 1, 1], [], []>} : vector<1x128xf32>, vector<128x8xf32>, vector<1x8xf32> -> vector<1x8xf32>
    %cst_36 = arith.constant dense<0xFF800000> : vector<1xf32>
    %88 = vector.multi_reduction <maximumf>, %87, %cst_36 [1] : vector<1x8xf32> to vector<1xf32>
    %89 = vector.shape_cast %88 : vector<1xf32> to vector<1x1xf32>
    %90 = vector.broadcast %89 : vector<1x1xf32> to vector<1x8xf32>
    %91 = arith.subf %87, %90 : vector<1x8xf32>
    %92 = math.exp %91 : vector<1x8xf32>
    %cst_37 = arith.constant dense<0.000000e+00> : vector<1xf32>
    %93 = vector.multi_reduction <add>, %92, %cst_37 [1] : vector<1x8xf32> to vector<1xf32>
    %94 = vector.shape_cast %93 : vector<1xf32> to vector<1x1xf32>
    %95 = vector.broadcast %94 : vector<1x1xf32> to vector<1x8xf32>
    %96 = arith.divf %92, %95 : vector<1x8xf32>
    %c0_38 = arith.constant 0 : index
    %c0_39 = arith.constant 0 : index
    %97 = vector.load %arg9[%c0_38, %c0_39] : memref<8x128xf32, #tpu.memory_space<vmem>>, vector<8x128xf32>
    %cst_40 = arith.constant dense<0.000000e+00> : vector<1x128xf32>
    %98 = tpu.matmul %96, %97, %cst_40 {dimension_numbers = #tpu.dot_dimension_numbers<[1], [0], [0], [1], [0, 0, 1, 1], [], []>} : vector<1x8xf32>, vector<8x128xf32>, vector<1x128xf32> -> vector<1x128xf32>
    %c0_41 = arith.constant 0 : index
    %c0_42 = arith.constant 0 : index
    %99 = vector.load %arg12[%c0_41, %c0_42] : memref<256x128xf32, #tpu.memory_space<vmem>>, vector<256x128xf32>
    %100 = tpu.concatenate %98, %82 in 1 : vector<1x128xf32>, vector<1x128xf32> -> vector<1x256xf32>
    %cst_43 = arith.constant dense<0.000000e+00> : vector<1x128xf32>
    %101 = tpu.matmul %100, %99, %cst_43 {dimension_numbers = #tpu.dot_dimension_numbers<[1], [0], [0], [1], [0, 0, 1, 1], [], []>} : vector<1x256xf32>, vector<256x128xf32>, vector<1x128xf32> -> vector<1x128xf32>
    %c0_44 = arith.constant 0 : index
    %c0_45 = arith.constant 0 : index
    %102 = vector.load %arg13[%c0_44, %c0_45] : memref<1x128xf32, #tpu.memory_space<vmem>>, vector<1x128xf32>
    %103 = arith.addf %101, %102 : vector<1x128xf32>
    %c0_46 = arith.constant 0 : index
    %c0_47 = arith.constant 0 : index
    %104 = vector.load %arg14[%c0_46, %c0_47] : memref<1x128xf32, #tpu.memory_space<vmem>>, vector<1x128xf32>
    tpu.vector_store %arg14[%c0_46, %c0_47], %103 {strides = array<i32>} : memref<1x128xf32, #tpu.memory_space<vmem>>, vector<1x128xf32>,
    return
  }
  func.func @transform_0(%arg0: i32, %arg1: memref<1xi32, #tpu.memory_space<smem>>) -> (i32, i32, i32) {
    %c0 = arith.constant 0 : index
    %0 = memref.load %arg1[%c0] : memref<1xi32, #tpu.memory_space<smem>>
    %c0_i32 = arith.constant 0 : i32
    %c0_i32_0 = arith.constant 0 : i32
    %c0_i32_1 = arith.constant 0 : i32
    return %0, %c0_i32, %c0_i32_0 : i32, i32, i32
  }
  func.func @transform_1(%arg0: i32, %arg1: memref<1xi32, #tpu.memory_space<smem>>) -> (i32, i32) {
    %c0_i32 = arith.constant 0 : i32
    %c0_i32_0 = arith.constant 0 : i32
    %c0_i32_1 = arith.constant 0 : i32
    return %c0_i32, %c0_i32_0 : i32, i32
  }
  func.func @transform_2(%arg0: i32, %arg1: memref<1xi32, #tpu.memory_space<smem>>) -> (i32, i32) {
    %c0_i32 = arith.constant 0 : i32
    %c0_i32_0 = arith.constant 0 : i32
    %c0_i32_1 = arith.constant 0 : i32
    return %c0_i32, %c0_i32_0 : i32, i32
  }
  func.func @transform_3(%arg0: i32, %arg1: memref<1xi32, #tpu.memory_space<smem>>) -> (i32, i32) {
    %c0_i32 = arith.constant 0 : i32
    %c0_i32_0 = arith.constant 0 : i32
    %c0_i32_1 = arith.constant 0 : i32
    return %c0_i32, %c0_i32_0 : i32, i32
  }
  func.func @transform_4(%arg0: i32, %arg1: memref<1xi32, #tpu.memory_space<smem>>) -> (i32, i32) {
    %c0_i32 = arith.constant 0 : i32
    %c0_i32_0 = arith.constant 0 : i32
    %c0_i32_1 = arith.constant 0 : i32
    return %c0_i32, %c0_i32_0 : i32, i32
  }
  func.func @transform_5(%arg0: i32, %arg1: memref<1xi32, #tpu.memory_space<smem>>) -> (i32, i32) {
    %c0_i32 = arith.constant 0 : i32
    %c0_i32_0 = arith.constant 0 : i32
    %c0_i32_1 = arith.constant 0 : i32
    return %c0_i32, %c0_i32_0 : i32, i32
  }
  func.func @transform_6(%arg0: i32, %arg1: memref<1xi32, #tpu.memory_space<smem>>) -> (i32, i32) {
    %c0_i32 = arith.constant 0 : i32
    %c0_i32_0 = arith.constant 0 : i32
    %c0_i32_1 = arith.constant 0 : i32
    return %c0_i32, %c0_i32_0 : i32, i32
  }
  func.func @transform_7(%arg0: i32, %arg1: memref<1xi32, #tpu.memory_space<smem>>) -> (i32, i32) {
    %c0_i32 = arith.constant 0 : i32
    %c0_i32_0 = arith.constant 0 : i32
    %c0_i32_1 = arith.constant 0 : i32
    return %c0_i32, %c0_i32_0 : i32, i32
  }
  func.func @transform_8(%arg0: i32, %arg1: memref<1xi32, #tpu.memory_space<smem>>) -> (i32, i32) {
    %c0_i32 = arith.constant 0 : i32
    %c0_i32_0 = arith.constant 0 : i32
    %c0_i32_1 = arith.constant 0 : i32
    return %c0_i32, %c0_i32_0 : i32, i32
  }
  func.func @transform_9(%arg0: i32, %arg1: memref<1xi32, #tpu.memory_space<smem>>) -> (i32, i32) {
    %c0_i32 = arith.constant 0 : i32
    %c0_i32_0 = arith.constant 0 : i32
    %c0_i32_1 = arith.constant 0 : i32
    return %c0_i32, %c0_i32_0 : i32, i32
  }
  func.func @transform_10(%arg0: i32, %arg1: memref<1xi32, #tpu.memory_space<smem>>) -> (i32, i32) {
    %c0_i32 = arith.constant 0 : i32
    %c0_i32_0 = arith.constant 0 : i32
    %c0_i32_1 = arith.constant 0 : i32
    return %c0_i32, %c0_i32_0 : i32, i32
  }
  func.func @transform_11(%arg0: i32, %arg1: memref<1xi32, #tpu.memory_space<smem>>) -> (i32, i32) {
    %c0_i32 = arith.constant 0 : i32
    %c0_i32_0 = arith.constant 0 : i32
    %c0_i32_1 = arith.constant 0 : i32
    return %c0_i32, %c0_i32_0 : i32, i32
  }
  func.func @transform_12(%arg0: i32, %arg1: memref<1xi32, #tpu.memory_space<smem>>) -> (i32, i32) {
    %c0_i32 = arith.constant 0 : i32
    %c0_i32_0 = arith.constant 0 : i32
    %c0_i32_1 = arith.constant 0 : i32
    return %c0_i32, %c0_i32_0 : i32, i32
  }
  func.func @transform_13(%arg0: i32, %arg1: memref<1xi32, #tpu.memory_space<smem>>) -> (i32, i32) {
    %c0_i32 = arith.constant 0 : i32
    %c0_i32_0 = arith.constant 0 : i32
    %c0_i32_1 = arith.constant 0 : i32
    return %c0_i32, %c0_i32_0 : i32, i32
  }
}

</mosaic_0001>

<bundles_post_ra>
// kernel: tpu_custom_call.1
= control target key start
LH: loop header
LB: loop body
LE: loop exit
PB: predicated region body
PF: predicated region fallthrough
CT: control target
= control target key end

     0   :  { %21 = vsyncpa [#allocation5], 0  ;;  %s1564_s0 = inlined_call_operand.<no memory space> [shape: s32[1], index: 0, kind: input, shape index: {}]   ;;  %s1565_s1 = inlined_call_operand.hbm [shape: f32[64,1,128], index: 1, kind: input, shape index: {}]   ;;  %s1566_s2 = inlined_call_operand.hbm [shape: f32[128,384], index: 2, kind: input, shape index: {}]   ;;  %s1567_s3 = inlined_call_operand.hbm [shape: f32[128,384], index: 3, kind: input, shape index: {}]   ;;  %s1568_s4 = inlined_call_operand.hbm [shape: f32[128,384], index: 4, kind: input, shape index: {}]   ;;  %s1569_s5 = inlined_call_operand.hbm [shape: f32[128,384], index: 5, kind: input, shape index: {}]   ;;  %s1570_s6 = inlined_call_operand.vmem [shape: f32[2,512], index: 6, kind: input, shape index: {}]   ;;  %s1571_s7 = inlined_call_operand.hbm [shape: f32[2,128], index: 7, kind: input, shape index: {}]   ;;  %s1572_s8 = inlined_call_operand.hbm [shape: f32[8,128], index: 8, kind: input, shape index: {}]   ;;  %s1573_s9 = inlined_call_operand.vmem [shape: f32[128,8], index: 9, kind: input, shape index: {}]   ;;  %s1574_s10 = inlined_call_operand.vmem [shape: f32[128,128], index: 10, kind: input, shape index: {}]   ;;  %s1575_s11 = inlined_call_operand.hbm [shape: f32[256,128], index: 11, kind: input, shape index: {}]   ;;  %s1576_s12 = inlined_call_operand.vmem [shape: f32[1,128], index: 12, kind: input, shape index: {}]   ;;  %s1577_s13 = inlined_call_operand.hbm [shape: f32[1,128], index: 13, kind: output, shape index: {0}]   ;;  %s1578_s14 = inlined_call_operand.hbm [shape: f32[2,128], index: 14, kind: output, shape index: {1}]  }
   0x1   :  { %22 = vsyncpa [#allocation8], 0 }
   0x2   :  { %23 = vsyncpa [#allocation11], 0 }
   0x3   :  { %24 = vsyncpa [#allocation14], 0 }
   0x4   :  { %25 = vsyncpa [#allocation17], 0 }
   0x5   :  { %26 = vsyncpa [#allocation6], 0  ;;  %s45_s15 = sshll.u32 %s1566_s2, 4  ;;  %s46_s15 = int_to_ptr.hbm [resolvable:$true] %s45_s15 }
   0x6   :  { %27 = vsyncpa [#allocation20], 0  ;;  %s1257_s16 = smov [#allocation7]   ;;  %s71_s20 = sshll.u32 %s1568_s4, 4  ;;  %s72_s20 = int_to_ptr.hbm [resolvable:$true] %s71_s20 }
   0x7   :  { %s47_s17 = sshll.u32 %s1257_s16, 4  ;;  %s1258_s21 = smov 384   ;;  %s48_s17 = int_to_ptr.vmem [resolvable:$true] %s47_s17 }
   0x8   :  { %s1259_s22 = smov 24   ;;  %s1260_s23 = smov [#allocation10]  }
   0x9   :  { %53 = dma.hbm_to_vmem [thread:$0]  %s46_s15, 6144, %s48_s17, [#allocation8], %s1258_s21, %s1258_s21, %s1259_s22  }
   0xa   :  { %s73_s24 = sshll.u32 %s1260_s23, 4  ;;  %s100_s26 = sshll.u32 %s1571_s7, 4  ;;  %s74_s24 = int_to_ptr.vmem [resolvable:$true] %s73_s24  ;;  %s101_s26 = int_to_ptr.hbm [resolvable:$true] %s100_s26 }
   0xb   :  { %79 = dma.hbm_to_vmem [thread:$0]  %s72_s20, 6144, %s74_s24, [#allocation11], %s1258_s21, %s1258_s21, %s1259_s22  }
   0xc   :  { %s33_s30 = scalar_lea.hbm %s1565_s1, %s1564_s0  ;;  %s1261_s15 = smov [#allocation13]  }
   0xd   :  { %s102_s16 = sshll.u32 %s1261_s15, 4  ;;  %s35_s17 = sshll.u32 %s33_s30, 4  ;;  %s103_s16 = int_to_ptr.vmem [resolvable:$true] %s102_s16  ;;  %s36_s17 = int_to_ptr.hbm [resolvable:$true] %s35_s17 }
   0xe   :  { %105 = dma.hbm_to_vmem [thread:$0]  %s101_s26, 32, %s103_s16, [#allocation14]  }
   0xf   :  { %s58_s19 = sshll.u32 %s1567_s3, 4  ;;  %s1262_s23 = smov [#allocation4]   ;;  %s59_s19 = int_to_ptr.hbm [resolvable:$true] %s58_s19 }
  0x10   :  { %s37_s25 = sshll.u32 %s1262_s23, 4  ;;  %s1075_s20 = sshra.s32 %s36_s17, 4  ;;  %s38_s25 = int_to_ptr.vmem [resolvable:$true] %s37_s25  ;;  %s1076_s20 = int_to_ptr.hbm [resolvable:$true] %s1075_s20 }
  0x11   :  { %s1077_s24 = scalar_lea.hbm %s1076_s20, 1  ;;  %s1079_s4 = scalar_lea.hbm %s1565_s1, 64 }
  0x12   :  { %p1078_p0 = scmp.ne.s32.totalorder %s1076_s20, %s1077_s24  ;;  %p1080_p1 = scmp.lt.s32.totalorder %s1076_s20, %s1565_s1 }
  0x13   :  { %p1081_p2 = scmp.lt.s32.totalorder %s1079_s4, %s1077_s24 }
  0x15   :  { %p1082_p3 = por %p1081_p2, %p1080_p1 }
  0x17   :  { %p1083_p4 = pnand %p1082_p3, %p1078_p0 }
  0x19   :  { %1086 = shalt.err (!%p1083_p4)
}
  0x1a   :  { %40 = dma.hbm_to_vmem [thread:$0]  %s36_s17, 16, %s38_s25, [#allocation5]  }
  0x1b   :  { %s1263_s3 = smov [#allocation9]   ;;  %s84_s15 = sshll.u32 %s1569_s5, 4  ;;  %s85_s15 = int_to_ptr.hbm [resolvable:$true] %s84_s15 }
  0x1c   :  { %s60_s26 = sshll.u32 %s1263_s3, 4  ;;  %s111_s1 = sshll.u32 %s1572_s8, 4  ;;  %s61_s26 = int_to_ptr.vmem [resolvable:$true] %s60_s26  ;;  %s112_s1 = int_to_ptr.hbm [resolvable:$true] %s111_s1 }
  0x1d   :  { %66 = dma.hbm_to_vmem [thread:$0]  %s59_s19, 6144, %s61_s26, [#allocation8], %s1258_s21, %s1258_s21, %s1259_s22  }
  0x1e   :  { %s1264_s18 = smov [#allocation12]   ;;  %s1265_s17 = smov [#allocation15]  }
  0x1f   :  { %s86_s23 = sshll.u32 %s1264_s18, 4  ;;  %s113_s5 = sshll.u32 %s1265_s17, 4  ;;  %s87_s23 = int_to_ptr.vmem [resolvable:$true] %s86_s23  ;;  %s114_s5 = int_to_ptr.vmem [resolvable:$true] %s113_s5 }
  0x20   :  { %92 = dma.hbm_to_vmem [thread:$0]  %s85_s15, 6144, %s87_s23, [#allocation11], %s1258_s21, %s1258_s21, %s1259_s22  }
  0x21   :  { %s125_s24 = sshll.u32 %s1575_s11, 4  ;;  %s1266_s19 = smov [#allocation16]   ;;  %s126_s24 = int_to_ptr.hbm [resolvable:$true] %s125_s24 }
  0x22   :  { %116 = dma.hbm_to_vmem [thread:$0]  %s112_s1, 128, %s114_s5, [#allocation14]  }
  0x23   :  { %s127_s2 = sshll.u32 %s1266_s19, 4  ;;  %s1267_s8 = smov 128   ;;  %s128_s2 = int_to_ptr.vmem [resolvable:$true] %s127_s2 }
  0x24   :  { %s1268_s0 = smov 8  }
  0x25   :  { %133 = dma.hbm_to_vmem [thread:$0]  %s126_s24, 4096, %s128_s2, [#allocation17], %s1267_s8, %s1267_s8, %s1268_s0  }
  0x26   :  { %1243 = dma.done.wait [#allocation5], 16  }
  0x27   :  { %1244 = vsyncadd [#allocation5], 4294967280 }
  0x28   :  { %1245 = dma.done.wait [#allocation8], 12288  }
  0x29   :  { %1246 = vsyncadd [#allocation8], 4294955008 }
  0x2a   :  { %1247 = dma.done.wait [#allocation11], 12288  }
  0x2b   :  { %1248 = vsyncadd [#allocation11], 4294955008 }
  0x2c   :  { %1249 = dma.done.wait [#allocation14], 160  }
  0x2d   :  { %1250 = vsyncadd [#allocation14], 4294967136 }
  0x2e   :  { %1251 = dma.done.wait [#allocation17], 4096  }
  0x2f   :  { %1252 = vsyncadd [#allocation17], 4294963200  ;;  %v215_v0 = vld [vmem:[#allocation7 + $0x168] sm:$0xff]  ;;  %v212_v1 = vld [vmem:[#allocation7 + $0x150] sm:$0xff]  ;;  %s939_s5 = sshll.u32 %s1578_s14, 4  ;;  %s1270_s24 = smov [#allocation18]   ;;  %s940_s5 = int_to_ptr.hbm [resolvable:$true] %s939_s5 }
  0x30   :  { %v263_v2 = vld [vmem:[#allocation10 + $0x168] sm:$0xff]  ;;  %267 = vmatpush.msra.mxu0 %v215_v0  ;;  %v260_v3 = vld [vmem:[#allocation10 + $0x150] sm:$0xff]  ;;  %v209_v4 = vld [vmem:[#allocation7 + $0x138] sm:$0xff]  ;;  %s926_s19 = sshll.u32 %s1270_s24, 4  ;;  %s928_s0 = sshll.u32 %s1577_s13, 4  ;;  %s927_s19 = int_to_ptr.vmem [resolvable:$true] %s926_s19  ;;  %s929_s0 = int_to_ptr.hbm [resolvable:$true] %s928_s0 }
  0x31   :  { %327 = vmatpush.msra.mxu3 %v263_v2  ;;  %v257_v5 = vld [vmem:[#allocation10 + $0x138] sm:$0xff]  ;;  %v216_v6 = vld [vmem:[#allocation7 + $0x170] sm:$0xff]  ;;  %v206_v8 = vld [vmem:[#allocation7 + $0x120] sm:$0xff] }
  0x32   :  { %268 = vmatpush.msra.mxu0 %v212_v1  ;;  %v213_v7 = vld [vmem:[#allocation7 + $0x158] sm:$0xff]  ;;  %287 = vmatpush.msra.mxu1 %v216_v6  ;;  %v254_v9 = vld [vmem:[#allocation10 + $0x120] sm:$0xff]  ;;  %v203_v11 = vld [vmem:[#allocation7 + $0x108] sm:$0xff] }
  0x33   :  { %328 = vmatpush.msra.mxu3 %v260_v3  ;;  %v210_v10 = vld [vmem:[#allocation7 + $0x140] sm:$0xff]  ;;  %v251_v12 = vld [vmem:[#allocation10 + $0x108] sm:$0xff]  ;;  %v200_v14 = vld [vmem:[#allocation7 + $0xf0] sm:$0xff] }
  0x34   :  { %269 = vmatpush.msra.mxu0 %v209_v4  ;;  %288 = vmatpush.msra.mxu1 %v213_v7  ;;  %v207_v13 = vld [vmem:[#allocation7 + $0x128] sm:$0xff]  ;;  %v248_v15 = vld [vmem:[#allocation10 + $0xf0] sm:$0xff]  ;;  %v197_v17 = vld [vmem:[#allocation7 + $0xd8] sm:$0xff] }
  0x35   :  { %329 = vmatpush.msra.mxu3 %v257_v5  ;;  %v204_v16 = vld [vmem:[#allocation7 + $0x110] sm:$0xff]  ;;  %v245_v18 = vld [vmem:[#allocation10 + $0xd8] sm:$0xff]  ;;  %v194_v20 = vld [vmem:[#allocation7 + $0xc0] sm:$0xff] }
  0x36   :  { %270 = vmatpush.msra.mxu0 %v206_v8  ;;  %289 = vmatpush.msra.mxu1 %v210_v10  ;;  %v201_v19 = vld [vmem:[#allocation7 + $0xf8] sm:$0xff]  ;;  %v242_v21 = vld [vmem:[#allocation10 + $0xc0] sm:$0xff]  ;;  %v191_v23 = vld [vmem:[#allocation7 + $0xa8] sm:$0xff] }
  0x37   :  { %330 = vmatpush.msra.mxu3 %v254_v9  ;;  %v198_v22 = vld [vmem:[#allocation7 + $0xe0] sm:$0xff]  ;;  %v239_v24 = vld [vmem:[#allocation10 + $0xa8] sm:$0xff]  ;;  %v188_v26 = vld [vmem:[#allocation7 + $0x90] sm:$0xff] }
  0x38   :  { %271 = vmatpush.msra.mxu0 %v203_v11  ;;  %290 = vmatpush.msra.mxu1 %v207_v13  ;;  %v195_v25 = vld [vmem:[#allocation7 + $0xc8] sm:$0xff]  ;;  %v236_v27 = vld [vmem:[#allocation10 + $0x90] sm:$0xff]  ;;  %v217_v28 = vld [vmem:[#allocation7 + $0x178] sm:$0xff] }
  0x39   :  { %331 = vmatpush.msra.mxu3 %v251_v12  ;;  %v192_v29 = vld [vmem:[#allocation7 + $0xb0] sm:$0xff]  ;;  %v214_v30 = vld [vmem:[#allocation7 + $0x160] sm:$0xff]  ;;  %v185_v31 = vld [vmem:[#allocation7 + $0x78] sm:$0xff]  ;;  %307 = vmatpush.msra.mxu2 %v217_v28 }
  0x3a   :  { %272 = vmatpush.msra.mxu0 %v200_v14  ;;  %291 = vmatpush.msra.mxu1 %v204_v16  ;;  %v233_v32 = vld [vmem:[#allocation10 + $0x78] sm:$0xff]  ;;  %v211_v34 = vld [vmem:[#allocation7 + $0x148] sm:$0xff]  ;;  %v182_v35 = vld [vmem:[#allocation7 + $0x60] sm:$0xff] }
  0x3b   :  { %332 = vmatpush.msra.mxu3 %v248_v15  ;;  %v189_v33 = vld [vmem:[#allocation7 + $0x98] sm:$0xff]  ;;  %v230_v36 = vld [vmem:[#allocation10 + $0x60] sm:$0xff]  ;;  %308 = vmatpush.msra.mxu2 %v214_v30  ;;  %v208_v38 = vld [vmem:[#allocation7 + $0x130] sm:$0xff] }
  0x3c   :  { %273 = vmatpush.msra.mxu0 %v197_v17  ;;  %292 = vmatpush.msra.mxu1 %v201_v19  ;;  %v186_v37 = vld [vmem:[#allocation7 + $0x80] sm:$0xff]  ;;  %v179_v39 = vld [vmem:[#allocation7 + $0x48] sm:$0xff]  ;;  %v205_v42 = vld [vmem:[#allocation7 + $0x118] sm:$0xff] }
  0x3d   :  { %333 = vmatpush.msra.mxu3 %v245_v18  ;;  %v227_v40 = vld [vmem:[#allocation10 + $0x48] sm:$0xff]  ;;  %309 = vmatpush.msra.mxu2 %v211_v34  ;;  %v176_v43 = vld [vmem:[#allocation7 + $0x30] sm:$0xff]  ;;  %v202_v46 = vld [vmem:[#allocation7 + $0x100] sm:$0xff] }
  0x3e   :  { %274 = vmatpush.msra.mxu0 %v194_v20  ;;  %293 = vmatpush.msra.mxu1 %v198_v22  ;;  %v183_v41 = vld [vmem:[#allocation7 + $0x68] sm:$0xff]  ;;  %v224_v44 = vld [vmem:[#allocation10 + $0x30] sm:$0xff]  ;;  %v173_v47 = vld [vmem:[#allocation7 + $0x18] sm:$0xff] }
  0x3f   :  { %334 = vmatpush.msra.mxu3 %v242_v21  ;;  %310 = vmatpush.msra.mxu2 %v208_v38  ;;  %v180_v45 = vld [vmem:[#allocation7 + $0x50] sm:$0xff]  ;;  %v221_v48 = vld [vmem:[#allocation10 + $0x18] sm:$0xff]  ;;  %v199_v50 = vld [vmem:[#allocation7 + $0xe8] sm:$0xff] }
  0x40   :  { %275 = vmatpush.msra.mxu0 %v191_v23  ;;  %294 = vmatpush.msra.mxu1 %v195_v25  ;;  %v177_v49 = vld [vmem:[#allocation7 + $0x38] sm:$0xff]  ;;  %v170_v51 = vld [vmem:[#allocation7] sm:$0xff]  ;;  %v264_v53 = vld [vmem:[#allocation10 + $0x170] sm:$0xff] }
  0x41   :  { %335 = vmatpush.msra.mxu3 %v239_v24  ;;  %311 = vmatpush.msra.mxu2 %v205_v42  ;;  %v218_v52 = vld [vmem:[#allocation10] sm:$0xff]  ;;  %v1393_v56 = vld [vmem:[#allocation4] sm:$0x1]  ;;  %v196_v58 = vld [vmem:[#allocation7 + $0xd0] sm:$0xff] }
  0x42   :  { %276 = vmatpush.msra.mxu0 %v188_v26  ;;  %295 = vmatpush.msra.mxu1 %v192_v29  ;;  %v1391_v54 = vld [vmem:[#allocation13] sm:$0x1]  ;;  %v261_v57 = vld [vmem:[#allocation10 + $0x158] sm:$0xff]  ;;  %v171_v59 = vld [vmem:[#allocation7 + $0x8] sm:$0xff] }
  0x43   :  { %336 = vmatpush.msra.mxu3 %v236_v27  ;;  %312 = vmatpush.msra.mxu2 %v202_v46  ;;  %v174_v55 = vld [vmem:[#allocation7 + $0x20] sm:$0xff]  ;;  %v265_v61 = vld [vmem:[#allocation10 + $0x178] sm:$0xff]  ;;  %v255_v63 = vld [vmem:[#allocation10 + $0x128] sm:$0xff] }
  0x44   :  { %277 = vmatpush.msra.mxu0 %v185_v31  ;;  %296 = vmatpush.msra.mxu1 %v189_v33  ;;  %v258_v60 = vld [vmem:[#allocation10 + $0x140] sm:$0xff]  ;;  %v193_v62 = vld [vmem:[#allocation7 + $0xb8] sm:$0xff]  ;;  %v252_v2 = vld [vmem:[#allocation10 + $0x110] sm:$0xff] }
  0x45   :  { %337 = vmatpush.msra.mxu3 %v233_v32  ;;  %313 = vmatpush.msra.mxu2 %v199_v50  ;;  %v262_v0 = vld [vmem:[#allocation10 + $0x160] sm:$0xff]  ;;  %v259_v3 = vld [vmem:[#allocation10 + $0x148] sm:$0xff]  ;;  %v249_v5 = vld [vmem:[#allocation10 + $0xf8] sm:$0xff] }
  0x46   :  { %278 = vmatpush.msra.mxu0 %v182_v35  ;;  %297 = vmatpush.msra.mxu1 %v186_v37  ;;  %v190_v1 = vld [vmem:[#allocation7 + $0xa0] sm:$0xff]  ;;  %v187_v4 = vld [vmem:[#allocation7 + $0x88] sm:$0xff]  ;;  %v256_v6 = vld [vmem:[#allocation10 + $0x130] sm:$0xff] }
  0x47   :  { %338 = vmatpush.msra.mxu3 %v230_v36  ;;  %314 = vmatpush.msra.mxu2 %v196_v58  ;;  %v184_v7 = vld [vmem:[#allocation7 + $0x70] sm:$0xff]  ;;  %v246_v8 = vld [vmem:[#allocation10 + $0xe0] sm:$0xff]  ;;  %v253_v9 = vld [vmem:[#allocation10 + $0x118] sm:$0xff] }
  0x48   :  { %279 = vmatpush.msra.mxu0 %v179_v39  ;;  %298 = vmatpush.msra.mxu1 %v183_v41  ;;  %v181_v10 = vld [vmem:[#allocation7 + $0x58] sm:$0xff]  ;;  %v243_v11 = vld [vmem:[#allocation10 + $0xc8] sm:$0xff]  ;;  %v250_v12 = vld [vmem:[#allocation10 + $0x100] sm:$0xff] }
  0x49   :  { %339 = vmatpush.msra.mxu3 %v227_v40  ;;  %315 = vmatpush.msra.mxu2 %v193_v62  ;;  %v178_v13 = vld [vmem:[#allocation7 + $0x40] sm:$0xff]  ;;  %v240_v14 = vld [vmem:[#allocation10 + $0xb0] sm:$0xff]  ;;  %v247_v15 = vld [vmem:[#allocation10 + $0xe8] sm:$0xff] }
  0x4a   :  { %280 = vmatpush.msra.mxu0 %v176_v43  ;;  %299 = vmatpush.msra.mxu1 %v180_v45  ;;  %v175_v16 = vld [vmem:[#allocation7 + $0x28] sm:$0xff]  ;;  %v237_v17 = vld [vmem:[#allocation10 + $0x98] sm:$0xff]  ;;  %v244_v18 = vld [vmem:[#allocation10 + $0xd0] sm:$0xff] }
  0x4b   :  { %340 = vmatpush.msra.mxu3 %v224_v44  ;;  %316 = vmatpush.msra.mxu2 %v190_v1  ;;  %v172_v19 = vld [vmem:[#allocation7 + $0x10] sm:$0xff]  ;;  %v234_v20 = vld [vmem:[#allocation10 + $0x80] sm:$0xff]  ;;  %v241_v21 = vld [vmem:[#allocation10 + $0xb8] sm:$0xff] }
  0x4c   :  { %281 = vmatpush.msra.mxu0 %v173_v47  ;;  %300 = vmatpush.msra.mxu1 %v177_v49  ;;  %v231_v22 = vld [vmem:[#allocation10 + $0x68] sm:$0xff]  ;;  %v238_v23 = vld [vmem:[#allocation10 + $0xa0] sm:$0xff]  ;;  %v228_v24 = vld [vmem:[#allocation10 + $0x50] sm:$0xff] }
  0x4d   :  { %341 = vmatpush.msra.mxu3 %v221_v48  ;;  %317 = vmatpush.msra.mxu2 %v187_v4  ;;  %v235_v25 = vld [vmem:[#allocation10 + $0x88] sm:$0xff]  ;;  %v225_v26 = vld [vmem:[#allocation10 + $0x38] sm:$0xff]  ;;  %v232_v27 = vld [vmem:[#allocation10 + $0x70] sm:$0xff] }
  0x4e   :  { %282 = vmatpush.msra.mxu0 %v170_v51  ;;  %301 = vmatpush.msra.mxu1 %v174_v55  ;;  %v222_v28 = vld [vmem:[#allocation10 + $0x20] sm:$0xff]  ;;  %v229_v29 = vld [vmem:[#allocation10 + $0x58] sm:$0xff]  ;;  %v219_v30 = vld [vmem:[#allocation10 + $0x8] sm:$0xff] }
  0x4f   :  { %342 = vmatpush.msra.mxu3 %v218_v52  ;;  %283 = vmatmul.f32.vlgmr.msra.gmra.mxu0 %v1393_v56  ;;  %v226_v31 = vld [vmem:[#allocation10 + $0x40] sm:$0xff]  ;;  %v223_v32 = vld [vmem:[#allocation10 + $0x28] sm:$0xff]  ;;  %v220_v33 = vld [vmem:[#allocation10 + $0x10] sm:$0xff] }
  0x50   :  { %347 = vmatpush.msrb.mxu0 %v264_v53  ;;  %343 = vmatmul.f32.vlgmr.msra.gmra.mxu3 %v1391_v54  ;;  %v492_v34 = vld [vmem:[#allocation9 + $0x168] sm:$0xff]  ;;  %v489_v35 = vld [vmem:[#allocation9 + $0x150] sm:$0xff]  ;;  %v486_v36 = vld [vmem:[#allocation9 + $0x138] sm:$0xff] }
  0x51   :  { %302 = vmatpush.msra.mxu1 %v171_v59  ;;  %318 = vmatpush.msra.mxu2 %v184_v7  ;;  %v483_v37 = vld [vmem:[#allocation9 + $0x120] sm:$0xff]  ;;  %v480_v38 = vld [vmem:[#allocation9 + $0x108] sm:$0xff]  ;;  %v477_v39 = vld [vmem:[#allocation9 + $0xf0] sm:$0xff] }
  0x52   :  { %348 = vmatpush.msrb.mxu0 %v261_v57  ;;  %303 = vmatmul.f32.vlgmr.msra.gmra.mxu1 %v1393_v56  ;;  %v474_v40 = vld [vmem:[#allocation9 + $0xd8] sm:$0xff]  ;;  %v471_v41 = vld [vmem:[#allocation9 + $0xc0] sm:$0xff]  ;;  %v468_v42 = vld [vmem:[#allocation9 + $0xa8] sm:$0xff] }
  0x53   :  { %367 = vmatpush.msrb.mxu1 %v265_v61  ;;  %319 = vmatpush.msra.mxu2 %v181_v10  ;;  %v465_v43 = vld [vmem:[#allocation9 + $0x90] sm:$0xff]  ;;  %v462_v44 = vld [vmem:[#allocation9 + $0x78] sm:$0xff]  ;;  %v459_v46 = vld [vmem:[#allocation9 + $0x60] sm:$0xff] }
  0x54   :  { %349 = vmatpush.msrb.mxu0 %v258_v60  ;;  %v493_v47 = vld [vmem:[#allocation9 + $0x170] sm:$0xff]  ;;  %v1404_v49 = vld [vmem:[%s1570_s6] ss:$2 sm:$0xf]  ;;  %v456_v52 = vld [vmem:[#allocation9 + $0x48] sm:$0xff] }
  0x55   :  { %368 = vmatpush.msrb.mxu1 %v262_v0  ;;  %320 = vmatpush.msra.mxu2 %v178_v13  ;;  %v494_v50 = vld [vmem:[#allocation9 + $0x178] sm:$0xff]  ;;  %v491_v55 = vld [vmem:[#allocation9 + $0x160] sm:$0xff]  ;;  %v453_v57 = vld [vmem:[#allocation9 + $0x30] sm:$0xff] }
  0x56   :  { %350 = vmatpush.msrb.mxu0 %v255_v63  ;;  %564 = vmatpush.msrb.mxu3 %v493_v47  ;;  %v490_v53 = vld [vmem:[#allocation9 + $0x158] sm:$0xff]  ;;  %v487_v58 = vld [vmem:[#allocation9 + $0x140] sm:$0xff]  ;;  %v488_v59 = vld [vmem:[#allocation9 + $0x148] sm:$0xff] }
  0x57   :  { %369 = vmatpush.msrb.mxu1 %v259_v3  ;;  %321 = vmatpush.msra.mxu2 %v175_v16  ;;  %v450_v61 = vld [vmem:[#allocation9 + $0x18] sm:$0xff]  ;;  %v484_v62 = vld [vmem:[#allocation9 + $0x128] sm:$0xff]  ;;  %v485_v63 = vld [vmem:[#allocation9 + $0x130] sm:$0xff] }
  0x58   :  { %351 = vmatpush.msrb.mxu0 %v252_v2  ;;  %565 = vmatpush.msrb.mxu3 %v490_v53  ;;  %v540_v0 = vld [vmem:[#allocation12 + $0x168] sm:$0xff]  ;;  %v447_v1 = vld [vmem:[#allocation9] sm:$0xff]  ;;  %v481_v2 = vld [vmem:[#allocation9 + $0x110] sm:$0xff] }
  0x59   :  { %370 = vmatpush.msrb.mxu1 %v256_v6  ;;  %322 = vmatpush.msra.mxu2 %v172_v19  ;;  %v482_v3 = vld [vmem:[#allocation9 + $0x118] sm:$0xff]  ;;  %v537_v4 = vld [vmem:[#allocation12 + $0x150] sm:$0xff]  ;;  %v479_v7 = vld [vmem:[#allocation9 + $0x100] sm:$0xff] }
  0x5a   :  { %352 = vmatpush.msrb.mxu0 %v249_v5  ;;  %323 = vmatmul.f32.vlgmr.msra.gmra.mxu2 %v1393_v56  ;;  %v541_v5 = vld [vmem:[#allocation12 + $0x170] sm:$0xff]  ;;  %v478_v6 = vld [vmem:[#allocation9 + $0xf8] sm:$0xff]  ;;  %v475_v10 = vld [vmem:[#allocation9 + $0xe0] sm:$0xff] }
  0x5b   :  { %371 = vmatpush.msrb.mxu1 %v253_v9  ;;  %544 = vmatpush.msrb.mxu2 %v492_v34  ;;  %v538_v9 = vld [vmem:[#allocation12 + $0x158] sm:$0xff]  ;;  %v535_v13 = vld [vmem:[#allocation12 + $0x140] sm:$0xff]  ;;  %v532_v19 = vld [vmem:[#allocation12 + $0x128] sm:$0xff] }
  0x5c   :  { %353 = vmatpush.msrb.mxu0 %v246_v8  ;;  %566 = vmatpush.msrb.mxu3 %v487_v58  ;;  %v534_v8 = vld [vmem:[#allocation12 + $0x138] sm:$0xff]  ;;  %v516_v34 = vld [vmem:[#allocation12 + $0xa8] sm:$0xff]  ;;  %v507_v53 = vld [vmem:[#allocation12 + $0x60] sm:$0xff] }
  0x5d   :  { %372 = vmatpush.msrb.mxu1 %v250_v12  ;;  %545 = vmatpush.msrb.mxu2 %v489_v35  ;;  %v531_v12 = vld [vmem:[#allocation12 + $0x120] sm:$0xff]  ;;  %v520_v35 = vld [vmem:[#allocation12 + $0xc8] sm:$0xff] }
  0x5e   :  { %354 = vmatpush.msrb.mxu0 %v243_v11  ;;  %567 = vmatpush.msrb.mxu3 %v484_v62  ;;  %v476_v11 = vld [vmem:[#allocation9 + $0xe8] sm:$0xff]  ;;  %v542_v62 = vld [vmem:[#allocation12 + $0x178] sm:$0xff] }
  0x5f   :  { %373 = vmatpush.msrb.mxu1 %v247_v15  ;;  %546 = vmatpush.msrb.mxu2 %v486_v36  ;;  %v472_v15 = vld [vmem:[#allocation9 + $0xc8] sm:$0xff]  ;;  %v457_v36 = vld [vmem:[#allocation9 + $0x50] sm:$0xff] }
  0x60   :  { %355 = vmatpush.msrb.mxu0 %v240_v14  ;;  %568 = vmatpush.msrb.mxu3 %v481_v2  ;;  %v505_v2 = vld [vmem:[#allocation12 + $0x50] sm:$0xff] }
  0x61   :  { %374 = vmatpush.msrb.mxu1 %v244_v18  ;;  %547 = vmatpush.msrb.mxu2 %v483_v37  ;;  %v528_v18 = vld [vmem:[#allocation12 + $0x108] sm:$0xff] }
  0x62   :  { %356 = vmatpush.msrb.mxu0 %v237_v17  ;;  %569 = vmatpush.msrb.mxu3 %v478_v6  ;;  %v473_v17 = vld [vmem:[#allocation9 + $0xd0] sm:$0xff]  ;;  %v502_v6 = vld [vmem:[#allocation12 + $0x38] sm:$0xff] }
  0x63   :  { %375 = vmatpush.msrb.mxu1 %v241_v21  ;;  %548 = vmatpush.msrb.mxu2 %v480_v38  ;;  %v470_v21 = vld [vmem:[#allocation9 + $0xb8] sm:$0xff] }
  0x64   :  { %357 = vmatpush.msrb.mxu0 %v234_v20  ;;  %570 = vmatpush.msrb.mxu3 %v475_v10  ;;  %v469_v20 = vld [vmem:[#allocation9 + $0xb0] sm:$0xff]  ;;  %v458_v38 = vld [vmem:[#allocation9 + $0x58] sm:$0xff]  ;;  %v495_v10 = vld [vmem:[#allocation12] sm:$0xff] }
  0x65   :  { %376 = vmatpush.msrb.mxu1 %v238_v23  ;;  %549 = vmatpush.msrb.mxu2 %v477_v39  ;;  %v529_v23 = vld [vmem:[#allocation12 + $0x110] sm:$0xff] }
  0x66   :  { %358 = vmatpush.msrb.mxu0 %v231_v22  ;;  %571 = vmatpush.msrb.mxu3 %v472_v15  ;;  %v525_v22 = vld [vmem:[#allocation12 + $0xf0] sm:$0xff]  ;;  %v436_v15 = vperm.slane %v1404_v49, 3 }
  0x67   :  { %377 = vmatpush.msrb.mxu1 %v235_v25  ;;  %550 = vmatpush.msrb.mxu2 %v474_v40  ;;  %v467_v25 = vld [vmem:[#allocation9 + $0xa0] sm:$0xff]  ;;  %v513_v39 = vld [vmem:[#allocation12 + $0x90] sm:$0xff] }
  0x68   :  { %359 = vmatpush.msrb.mxu0 %v228_v24  ;;  %572 = vmatpush.msrb.mxu3 %v469_v20  ;;  %v466_v24 = vld [vmem:[#allocation9 + $0x98] sm:$0xff] }
  0x69   :  { %378 = vmatpush.msrb.mxu1 %v232_v27  ;;  %551 = vmatpush.msrb.mxu2 %v471_v41  ;;  %v526_v27 = vld [vmem:[#allocation12 + $0xf8] sm:$0xff] }
  0x6a   :  { %360 = vmatpush.msrb.mxu0 %v225_v26  ;;  %573 = vmatpush.msrb.mxu3 %v466_v24  ;;  %v522_v26 = vld [vmem:[#allocation12 + $0xd8] sm:$0xff] }
  0x6b   :  { %379 = vmatpush.msrb.mxu1 %v229_v29  ;;  %552 = vmatpush.msrb.mxu2 %v468_v42  ;;  %v464_v29 = vld [vmem:[#allocation9 + $0x88] sm:$0xff]  ;;  %v517_v42 = vld [vmem:[#allocation12 + $0xb0] sm:$0xff] }
  0x6c   :  { %361 = vmatpush.msrb.mxu0 %v222_v28  ;;  %v463_v28 = vld [vmem:[#allocation9 + $0x80] sm:$0xff] }
  0x6d   :  { %380 = vmatpush.msrb.mxu1 %v226_v31  ;;  %553 = vmatpush.msrb.mxu2 %v465_v43  ;;  %v523_v31 = vld [vmem:[#allocation12 + $0xe0] sm:$0xff]  ;;  %v454_v43 = vld [vmem:[#allocation9 + $0x38] sm:$0xff] }
  0x6e   :  { %362 = vmatpush.msrb.mxu0 %v219_v30  ;;  %v519_v30 = vld [vmem:[#allocation12 + $0xc0] sm:$0xff]  ;;  %574 = vmatpush.msrb.mxu3 %v463_v28  ;;  %v524_v28 = vld [vmem:[#allocation12 + $0xe8] sm:$0xff] }
  0x6f   :  { %363 = vmatmul.f32.vlgmr.msrb.gmra.mxu0 %v1391_v54  ;;  %381 = vmatpush.msrb.mxu1 %v223_v32  ;;  %v460_v32 = vld [vmem:[#allocation9 + $0x68] sm:$0xff] }
  0x70   :  { %554 = vmatpush.msrb.mxu2 %v462_v44  ;;  %584 = vmatpush.msra.mxu0 %v494_v50  ;;  %v411_v44 = vperm.slane %v1404_v49, 1  ;;  %v451_v50 = vld [vmem:[#allocation9 + $0x20] sm:$0xff] }
  0x71   :  { %382 = vmatpush.msrb.mxu1 %v220_v33  ;;  %v461_v33 = vld [vmem:[#allocation9 + $0x70] sm:$0xff]  ;;  %575 = vmatpush.msrb.mxu3 %v460_v32  ;;  %v518_v32 = vld [vmem:[#allocation12 + $0xb8] sm:$0xff] }
  0x72   :  { %383 = vmatmul.f32.vlgmr.msrb.gmra.mxu1 %v1391_v54  ;;  %555 = vmatpush.msrb.mxu2 %v459_v46  ;;  %v510_v46 = vld [vmem:[#allocation12 + $0x78] sm:$0xff] }
  0x73   :  { %585 = vmatpush.msra.mxu0 %v491_v55  ;;  %604 = vmatpush.msra.mxu1 %v540_v0 }
  0x74   :  { %556 = vmatpush.msrb.mxu2 %v456_v52  ;;  %576 = vmatpush.msrb.mxu3 %v457_v36  ;;  %v452_v52 = vld [vmem:[#allocation9 + $0x28] sm:$0xff] }
  0x75   :  { %586 = vmatpush.msra.mxu0 %v488_v59  ;;  %605 = vmatpush.msra.mxu1 %v537_v4  ;;  %v449_v59 = vld [vmem:[#allocation9 + $0x10] sm:$0xff] }
  0x76   :  { %557 = vmatpush.msrb.mxu2 %v453_v57  ;;  %577 = vmatpush.msrb.mxu3 %v454_v43  ;;  %v448_v57 = vld [vmem:[#allocation9 + $0x8] sm:$0xff]  ;;  %v506_v43 = vld [vmem:[#allocation12 + $0x58] sm:$0xff] }
  0x77   :  { %587 = vmatpush.msra.mxu0 %v485_v63  ;;  %606 = vmatpush.msra.mxu1 %v534_v8 }
  0x78   :  { %558 = vmatpush.msrb.mxu2 %v450_v61  ;;  %578 = vmatpush.msrb.mxu3 %v451_v50  ;;  %v508_v61 = vld [vmem:[#allocation12 + $0x68] sm:$0xff] }
  0x79   :  { %588 = vmatpush.msra.mxu0 %v482_v3  ;;  %607 = vmatpush.msra.mxu1 %v531_v12  ;;  %v539_v3 = vld [vmem:[#allocation12 + $0x160] sm:$0xff]  ;;  %v500_v50 = vld [vmem:[#allocation12 + $0x28] sm:$0xff] }
  0x7a   :  { %559 = vmatpush.msrb.mxu2 %v447_v1  ;;  %579 = vmatpush.msrb.mxu3 %v448_v57  ;;  %v501_v1 = vld [vmem:[#allocation12 + $0x30] sm:$0xff] }
  0x7b   :  { %589 = vmatpush.msra.mxu0 %v479_v7  ;;  %608 = vmatpush.msra.mxu1 %v528_v18  ;;  %v536_v7 = vld [vmem:[#allocation12 + $0x148] sm:$0xff]  ;;  %v740_v57 = vld [vmem:[%s1574_s10 + $0x78] sm:$0xff] }
  0x7c   :  { %624 = vmatpush.msra.mxu2 %v541_v5  ;;  %644 = vmatpush.msra.mxu3 %v542_v62  ;;  %v498_v5 = vld [vmem:[#allocation12 + $0x18] sm:$0xff]  ;;  %v734_v62 = vld [vmem:[%s1574_s10 + $0x48] sm:$0xff] }
  0x7d   :  { %590 = vmatpush.msra.mxu0 %v476_v11  ;;  %609 = vmatpush.msra.mxu1 %v525_v22  ;;  %v499_v11 = vld [vmem:[#allocation12 + $0x20] sm:$0xff] }
  0x7e   :  { %625 = vmatpush.msra.mxu2 %v538_v9  ;;  %645 = vmatpush.msra.mxu3 %v539_v3  ;;  %v732_v3 = vld [vmem:[%s1574_s10 + $0x38] sm:$0xff] }
  0x7f   :  { %591 = vmatpush.msra.mxu0 %v473_v17  ;;  %610 = vmatpush.msra.mxu1 %v522_v26  ;;  %v496_v17 = vld [vmem:[#allocation12 + $0x8] sm:$0xff] }
  0x80   :  { %626 = vmatpush.msra.mxu2 %v535_v13  ;;  %v533_v13 = vld [vmem:[#allocation12 + $0x130] sm:$0xff]  ;;  %646 = vmatpush.msra.mxu3 %v536_v7 }
  0x81   :  { %592 = vmatpush.msra.mxu0 %v470_v21  ;;  %611 = vmatpush.msra.mxu1 %v519_v30  ;;  %v530_v21 = vld [vmem:[#allocation12 + $0x118] sm:$0xff] }
  0x82   :  { %627 = vmatpush.msra.mxu2 %v532_v19  ;;  %647 = vmatpush.msra.mxu3 %v533_v13 }
  0x83   :  { %593 = vmatpush.msra.mxu0 %v467_v25  ;;  %612 = vmatpush.msra.mxu1 %v516_v34  ;;  %v433_v25 = vperm.slane %v1404_v49, 2 }
  0x84   :  { %628 = vmatpush.msra.mxu2 %v529_v23  ;;  %v527_v23 = vld [vmem:[#allocation12 + $0x100] sm:$0xff]  ;;  %648 = vmatpush.msra.mxu3 %v530_v21 }
  0x85   :  { %594 = vmatpush.msra.mxu0 %v464_v29  ;;  %613 = vmatpush.msra.mxu1 %v513_v39  ;;  %v521_v29 = vld [vmem:[#allocation12 + $0xd0] sm:$0xff] }
  0x86   :  { %629 = vmatpush.msra.mxu2 %v526_v27  ;;  %649 = vmatpush.msra.mxu3 %v527_v23  ;;  %v776_v23 = vld [vmem:[%s1573_s9 + $0x78] sm:$0xff] }
  0x87   :  { %595 = vmatpush.msra.mxu0 %v461_v33  ;;  %614 = vmatpush.msra.mxu1 %v510_v46  ;;  %v503_v46 = vld [vmem:[#allocation12 + $0x40] sm:$0xff] }
  0x88   :  { %630 = vmatpush.msra.mxu2 %v523_v31  ;;  %650 = vmatpush.msra.mxu3 %v524_v28 }
  0x89   :  { %596 = vmatpush.msra.mxu0 %v458_v38  ;;  %615 = vmatpush.msra.mxu1 %v507_v53  ;;  %v512_v38 = vld [vmem:[#allocation12 + $0x88] sm:$0xff] }
  0x8a   :  { %631 = vmatpush.msra.mxu2 %v520_v35  ;;  %651 = vmatpush.msra.mxu3 %v521_v29  ;;  %v515_v35 = vld [vmem:[#allocation12 + $0xa0] sm:$0xff] }
  0x8c   :  { %632 = vmatpush.msra.mxu2 %v517_v42  ;;  %652 = vmatpush.msra.mxu3 %v518_v32  ;;  %v771_v32 = vld [vmem:[%s1573_s9 + $0x50] sm:$0xff] }
  0x8e   :  { %653 = vmatpush.msra.mxu3 %v515_v35 }
  0x90   :  { %654 = vmatpush.msra.mxu3 %v512_v38 }
  0xcc   :  { %v284_v45 = vpop.f32.mrf.mxu0 }
  0xcf   :  { %v304_v40 = vpop.f32.mrf.mxu1 }
  0xd3   :  { %v344_v48 = vpop.f32.mrf.mxu3 }
  0xd4   :  { %v388_v51 = vadd.f32 %v344_v48, %v284_v45  ;;  %v455_v45 = vld [vmem:[#allocation9 + $0x40] sm:$0xff]  ;;  %v514_v48 = vld [vmem:[#allocation12 + $0x98] sm:$0xff] }
  0xd5   :  { %597 = vmatpush.msra.mxu0 %v455_v45  ;;  %633 = vmatpush.msra.mxu2 %v514_v48 }
  0xd6   :  { %v389_v56 = vadd.f32 %v388_v51, %v1404_v49 }
  0xd7   :  { %598 = vmatpush.msra.mxu0 %v452_v52 }
  0xd8   :  { %v959_v60 = vmul.f32 -1.442695, %v389_v56  ;;  %v511_v56 = vld [vmem:[#allocation12 + $0x80] sm:$0xff] }
  0xd9   :  { %634 = vmatpush.msra.mxu2 %v511_v56  ;;  %599 = vmatpush.msra.mxu0 %v449_v59  ;;  %v737_v59 = vld [vmem:[%s1574_s10 + $0x60] sm:$0xff] }
  0xda   :  { %979 = vpow2.f32 %v959_v60  ;;  %v504_v60 = vld [vmem:[#allocation12 + $0x48] sm:$0xff] }
  0xdb   :  { %616 = vmatpush.msra.mxu1 %v504_v60  ;;  %635 = vmatpush.msra.mxu2 %v508_v61  ;;  %v736_v60 = vld [vmem:[%s1574_s10 + $0x58] sm:$0xff]  ;;  %v735_v61 = vld [vmem:[%s1574_s10 + $0x50] sm:$0xff] }
  0xdc   :  { %741 = vmatpush.msrb.mxu0 %v740_v57  ;;  %v766_v57 = vld [vmem:[%s1573_s9 + $0x28] sm:$0xff] }
  0xdd   :  { %617 = vmatpush.msra.mxu1 %v501_v1  ;;  %636 = vmatpush.msra.mxu2 %v505_v2  ;;  %v324_v27 = vpop.f32.mrf.mxu2 }
  0xde   :  { %v435_v31 = vadd.f32 %v433_v25, %v324_v27  ;;  %v774_v25 = vld [vmem:[%s1573_s9 + $0x68] sm:$0xff] }
  0xdf   :  { %618 = vmatpush.msra.mxu1 %v498_v5  ;;  %637 = vmatpush.msra.mxu2 %v502_v6  ;;  %v731_v6 = vld [vmem:[%s1574_s10 + $0x30] sm:$0xff] }
  0xe0   :  { %v980_v14 = vpop.eup %979 }
  0xe1   :  { %v1407_v16 = vadd.f32 1.0, %v980_v14  ;;  %v1429_v14 = vld [vmem:[#allocation13 + $0x1] sm:$0x1]  ;;  %619 = vmatpush.msra.mxu1 %v495_v10  ;;  %638 = vmatpush.msra.mxu2 %v499_v11  ;;  %v728_v11 = vld [vmem:[%s1574_s10 + $0x18] sm:$0xff] }
  0xe2   :  { %620 = vmatmul.f32.vlgmr.msra.gmra.mxu1 %v1429_v14 }
  0xe3   :  { %981 = vrcp.f32 %v1407_v16  ;;  %vm399_vm0 = vweird.f32 %v1407_v16  ;;  %v405_v4 = vand.u32 2147483648, %v1407_v16  ;;  %v403_v9 = vand.u32 2147483647, %v1407_v16  ;;  %639 = vmatpush.msra.mxu2 %v496_v17  ;;  %v727_v17 = vld [vmem:[%s1574_s10 + $0x10] sm:$0xff]  ;;  %777 = vmatpush.msrb.mxu1 %v776_v23  ;;  %v874_v23 = vld [vmem:[#allocation16 + $0xd8] sm:$0xff] }
  0xe5   :  { %v406_v20 = vor.u32 1.1754944e-38, %v405_v4  ;;  %vm404_vm3 = vcmp.eq.f32.partialorder %v403_v9, 8.507059e+37  ;;  %v1470_v4 = vld [vmem:[%s1570_s6 + $0x1] ss:$2 sm:$0xf] }
  0xe6   :  { %v729_v9 = vld [vmem:[%s1574_s10 + $0x20] sm:$0xff]  ;;  %v689_v10 = vperm.slane %v1470_v4, 1 }
  0xe9   :  { %v1410_v37 = vpop.eup %981 }
  0xea   :  { %v395_v41 = vmul.f32 %v1410_v37, %v1407_v16  ;;  %vm400_vm1 = vweird.f32 %v1410_v37 }
  0xeb   :  { %vm1425_vm2 = vmor %vm399_vm0, %vm400_vm1  ;;  %vm797_vm0 = vcmask 57344  }
  0xec   :  { %v364_v47 = vpop.f32.mrf.mxu0  ;;  %v396_v55 = vsub.f32 1.0, %v395_v41  ;;  %v509_v41 = vld [vmem:[#allocation12 + $0x70] sm:$0xff] }
  0xed   :  { %v409_v51 = vadd.f32 %v364_v47, %v304_v40  ;;  %655 = vmatpush.msra.mxu3 %v509_v41 }
  0xee   :  { %v397_v0 = vmul.f32 %v1410_v37, %v396_v55  ;;  %v497_v55 = vld [vmem:[#allocation12 + $0x10] sm:$0xff] }
  0xef   :  { %v413_v58 = vadd.f32 %v411_v44, %v409_v51  ;;  %v384_v19 = vpop.f32.mrf.mxu1  ;;  %656 = vmatpush.msra.mxu3 %v506_v43 }
  0xf0   :  { %v398_v8 = vadd.f32 %v1410_v37, %v397_v0  ;;  %v438_v24 = vadd.f32 %v436_v15, %v384_v19  ;;  %v733_v0 = vld [vmem:[%s1574_s10 + $0x40] sm:$0xff]  ;;  %v726_v19 = vld [vmem:[%s1574_s10 + $0x8] sm:$0xff] }
  0xf1   :  { %v960_v63 = vmul.f32 -1.442695, %v413_v58  ;;  %657 = vmatpush.msra.mxu3 %v503_v46  ;;  %v738_v58 = vld [vmem:[%s1574_s10 + $0x68] sm:$0xff]  ;;  %v768_v46 = vld [vmem:[%s1573_s9 + $0x38] sm:$0xff] }
  0xf2   :  { %v402_v22 = vsel %vm1425_vm2, %v1410_v37, %v398_v8  ;;  %v730_v8 = vld [vmem:[%s1574_s10 + $0x28] sm:$0xff] }
  0xf3   :  { %983 = vpow2.f32 %v960_v63  ;;  %v407_v26 = vsel %vm404_vm3, %v406_v20, %v402_v22  ;;  %658 = vmatpush.msra.mxu3 %v500_v50 }
  0xf4   :  { %v439_v30 = vmul.f32 %v438_v24, %v407_v26  ;;  %v775_v24 = vld [vmem:[%s1573_s9 + $0x70] sm:$0xff]  ;;  %v773_v26 = vld [vmem:[%s1573_s9 + $0x60] sm:$0xff] }
  0xf5   :  { %659 = vmatpush.msra.mxu3 %v497_v55  ;;  %778 = vmatpush.msrb.mxu1 %v775_v24  ;;  %v873_v24 = vld [vmem:[#allocation16 + $0xd0] sm:$0xff] }
  0xf6   :  { %v440_v36 = vadd.f32 %v439_v30, %v435_v31  ;;  %v772_v30 = vld [vmem:[%s1573_s9 + $0x58] sm:$0xff] }
  0xf7   :  { %779 = vmatpush.msrb.mxu1 %v774_v25  ;;  %v872_v25 = vld [vmem:[#allocation16 + $0xc8] sm:$0xff] }
  0xf9   :  { %v984_v18 = vpop.eup %983  ;;  %780 = vmatpush.msrb.mxu1 %v773_v26  ;;  %v871_v26 = vld [vmem:[#allocation16 + $0xc0] sm:$0xff] }
  0xfa   :  { %v417_v16 = vadd.f32 1.0, %v984_v18 }
  0xfb   :  { %781 = vmatpush.msrb.mxu1 %v772_v30  ;;  %v867_v30 = vld [vmem:[#allocation16 + $0xa0] sm:$0xff] }
  0xfc   :  { %985 = vrcp.f32 %v417_v16  ;;  %v429_v39 = vand.u32 2147483648, %v417_v16  ;;  %v427_v40 = vand.u32 2147483647, %v417_v16  ;;  %vm423_vm5 = vweird.f32 %v417_v16 }
  0xfd   :  { %987 = vtanh.f32 %v440_v36  ;;  %782 = vmatpush.msrb.mxu1 %v771_v32  ;;  %v865_v32 = vld [vmem:[#allocation16 + $0x90] sm:$0xff] }
  0xfe   :  { %v430_v44 = vor.u32 1.1754944e-38, %v429_v39  ;;  %vm428_vm7 = vcmp.eq.f32.partialorder %v427_v40, 8.507059e+37  ;;  %v711_v40 = vperm.slane %v1470_v4, 2 }
 0x102   :  { %v986_v33 = vpop.eup %985 }
 0x103   :  { %v419_v34 = vmul.f32 %v986_v33, %v417_v16  ;;  %vm424_vm4 = vweird.f32 %v986_v33  ;;  %v988_v51 = vpop.eup %987  ;;  %v725_v16 = vld [vmem:[%s1574_s10] sm:$0xff] }
 0x104   :  { %vm425_vm6 = vmor %vm423_vm5, %vm424_vm4  ;;  %vm823_vm5 = vcmask 64512  }
 0x105   :  { %v420_v37 = vsub.f32 1.0, %v419_v34  ;;  %v714_v34 = vperm.slane %v1470_v4, 3 }
 0x107   :  { %v421_v49 = vmul.f32 %v986_v33, %v420_v37  ;;  %v770_v37 = vld [vmem:[%s1573_s9 + $0x48] sm:$0xff] }
 0x108   :  { %783 = vmatpush.msrb.mxu1 %v770_v37  ;;  %v860_v37 = vld [vmem:[#allocation16 + $0x68] sm:$0xff] }
 0x109   :  { %v422_v42 = vadd.f32 %v986_v33, %v421_v49  ;;  %v769_v49 = vld [vmem:[%s1573_s9 + $0x40] sm:$0xff] }
 0x10a   :  { %784 = vmatpush.msrb.mxu1 %v769_v49  ;;  %v858_v49 = vld [vmem:[#allocation16 + $0x58] sm:$0xff] }
 0x10b   :  { %v426_v45 = vsel %vm425_vm6, %v986_v33, %v422_v42 }
 0x10c   :  { %v431_v47 = vsel %vm428_vm7, %v430_v44, %v426_v45  ;;  %785 = vmatpush.msrb.mxu1 %v768_v46  ;;  %v854_v46 = vld [vmem:[#allocation16 + $0x38] sm:$0xff] }
 0x10d   :  { %v442_v48 = vsub.f32 1.0, %v431_v47  ;;  %v444_v53 = vmul.f32 %v431_v47, %v1391_v54  ;;  %v739_v54 = vld [vmem:[%s1574_s10 + $0x70] sm:$0xff] }
 0x10e   :  { %742 = vmatpush.msrb.mxu0 %v739_v54 }
 0x10f   :  { %v443_v52 = vmul.f32 %v988_v51, %v442_v48  ;;  %v767_v51 = vld [vmem:[%s1573_s9 + $0x30] sm:$0xff] }
 0x110   :  { %743 = vmatpush.msrb.mxu0 %v738_v58  ;;  %786 = vmatpush.msrb.mxu1 %v767_v51  ;;  %v853_v51 = vld [vmem:[#allocation16 + $0x30] sm:$0xff] }
 0x111   :  { %v445_v56 = vadd.f32 %v444_v53, %v443_v52 }
 0x112   :  { %744 = vmatpush.msrb.mxu0 %v737_v59  ;;  %787 = vmatpush.msrb.mxu1 %v766_v57  ;;  %v851_v57 = vld [vmem:[#allocation16 + $0x20] sm:$0xff] }
 0x113   :  { %560 = vmatmul.f32.vlgmr.msrb.gmra.mxu2 %v445_v56  ;;  %446 = vst [vmem:[#allocation19] sm:$0x1] %v445_v56  ;;  %580 = vmatmul.f32.vlgmr.msrb.gmra.mxu3 %v445_v56 }
 0x114   :  { %600 = vmatmul.f32.vlgmr.msra.gmra.mxu0 %v445_v56 }
 0x115   :  { %745 = vmatpush.msrb.mxu0 %v736_v60  ;;  %v765_v60 = vld [vmem:[%s1573_s9 + $0x20] sm:$0xff] }
 0x116   :  { %788 = vmatpush.msrb.mxu1 %v765_v60  ;;  %v849_v60 = vld [vmem:[#allocation16 + $0x10] sm:$0xff] }
 0x117   :  { %746 = vmatpush.msrb.mxu0 %v735_v61 }
 0x119   :  { %747 = vmatpush.msrb.mxu0 %v734_v62 }
 0x11b   :  { %640 = vmatmul.f32.vlgmr.msra.gmra.mxu2 %v1429_v14  ;;  %660 = vmatmul.f32.vlgmr.msra.gmra.mxu3 %v1429_v14 }
 0x11c   :  { %748 = vmatpush.msrb.mxu0 %v733_v0 }
 0x11e   :  { %749 = vmatpush.msrb.mxu0 %v732_v3 }
 0x120   :  { %750 = vmatpush.msrb.mxu0 %v731_v6 }
 0x122   :  { %751 = vmatpush.msrb.mxu0 %v730_v8 }
 0x124   :  { %752 = vmatpush.msrb.mxu0 %v729_v9  ;;  %v761_v9 = vld [vmem:[%s1573_s9] sm:$0xff] }
 0x126   :  { %753 = vmatpush.msrb.mxu0 %v728_v11 }
 0x128   :  { %754 = vmatpush.msrb.mxu0 %v727_v17 }
 0x12a   :  { %755 = vmatpush.msrb.mxu0 %v726_v19 }
 0x12c   :  { %756 = vmatpush.msrb.mxu0 %v725_v16  ;;  %v876_v16 = vld [vmem:[#allocation16 + $0xe8] sm:$0xff] }
 0x15f   :  { %v621_v63 = vpop.f32.mrf.mxu1 }
 0x191   :  { %v601_v44 = vpop.f32.mrf.mxu0 }
 0x192   :  { %v713_v52 = vadd.f32 %v711_v40, %v601_v44  ;;  %v857_v40 = vld [vmem:[#allocation16 + $0x50] sm:$0xff]  ;;  %v855_v44 = vld [vmem:[#allocation16 + $0x40] sm:$0xff] }
 0x196   :  { %v561_v1 = vpop.f32.mrf.mxu2  ;;  %v581_v12 = vpop.f32.mrf.mxu3 }
 0x197   :  { %v666_v2 = vadd.f32 %v621_v63, %v561_v1  ;;  %v764_v63 = vld [vmem:[%s1573_s9 + $0x18] sm:$0xff] }
 0x198   :  { %789 = vmatpush.msrb.mxu1 %v764_v63 }
 0x199   :  { %v667_v5 = vadd.f32 %v1470_v4, %v666_v2  ;;  %v763_v2 = vld [vmem:[%s1573_s9 + $0x10] sm:$0xff]  ;;  %v762_v4 = vld [vmem:[%s1573_s9 + $0x8] sm:$0xff]  ;;  %s1269_s9 = smov [#allocation19]  }
 0x19a   :  { %790 = vmatpush.msrb.mxu1 %v763_v2  ;;  %s937_s23 = sshll.u32 %s1269_s9, 4  ;;  %s938_s23 = int_to_ptr.vmem [resolvable:$true] %s937_s23 }
 0x19b   :  { %v962_v7 = vmul.f32 -1.442695, %v667_v5 }
 0x19c   :  { %791 = vmatpush.msrb.mxu1 %v762_v4 }
 0x19d   :  { %989 = vpow2.f32 %v962_v7 }
 0x19e   :  { %v641_v13 = vpop.f32.mrf.mxu2  ;;  %v661_v35 = vpop.f32.mrf.mxu3  ;;  %792 = vmatpush.msrb.mxu1 %v761_v9 }
 0x19f   :  { %v687_v15 = vadd.f32 %v641_v13, %v581_v12  ;;  %v716_v42 = vadd.f32 %v714_v34, %v661_v35  ;;  %v822_v13 = vld [vmem:[#allocation15] sm:$0xff]  ;;  %v863_v34 = vld [vmem:[#allocation16 + $0x80] sm:$0xff] }
 0x1a0   :  { %842 = vmatpush.msrb.mxu2 %v822_v13  ;;  %v862_v35 = vld [vmem:[#allocation16 + $0x78] sm:$0xff] }
 0x1a1   :  { %v691_v18 = vadd.f32 %v689_v10, %v687_v15  ;;  %v877_v15 = vld [vmem:[#allocation16 + $0xf0] sm:$0xff]  ;;  %880 = vmatpush.msrb.mxu3 %v862_v35 }
 0x1a3   :  { %v990_v20 = vpop.eup %989  ;;  %v963_v21 = vmul.f32 -1.442695, %v691_v18 }
 0x1a4   :  { %v671_v22 = vadd.f32 1.0, %v990_v20 }
 0x1a5   :  { %991 = vpow2.f32 %v963_v21 }
 0x1a6   :  { %993 = vrcp.f32 %v671_v22  ;;  %v683_v36 = vand.u32 2147483648, %v671_v22  ;;  %v681_v39 = vand.u32 2147483647, %v671_v22  ;;  %vm677_vm9 = vweird.f32 %v671_v22 }
 0x1a8   :  { %v684_v45 = vor.u32 1.1754944e-38, %v683_v36  ;;  %vm682_vm11 = vcmp.eq.f32.partialorder %v681_v39, 8.507059e+37  ;;  %v861_v36 = vld [vmem:[#allocation16 + $0x70] sm:$0xff]  ;;  %v859_v39 = vld [vmem:[#allocation16 + $0x60] sm:$0xff] }
 0x1a9   :  { %881 = vmatpush.msrb.mxu3 %v861_v36 }
 0x1ab   :  { %v992_v27 = vpop.eup %991  ;;  %882 = vmatpush.msrb.mxu3 %v860_v37 }
 0x1ac   :  { %v994_v28 = vpop.eup %993  ;;  %v695_v29 = vadd.f32 1.0, %v992_v27  ;;  %v870_v27 = vld [vmem:[#allocation16 + $0xb8] sm:$0xff] }
 0x1ad   :  { %v673_v31 = vmul.f32 %v994_v28, %v671_v22  ;;  %vm678_vm8 = vweird.f32 %v994_v28  ;;  %v875_v22 = vld [vmem:[#allocation16 + $0xe0] sm:$0xff]  ;;  %883 = vmatpush.msrb.mxu3 %v859_v39 }
 0x1ae   :  { %995 = vrcp.f32 %v695_v29  ;;  %vm679_vm10 = vmor %vm677_vm9, %vm678_vm8  ;;  %v707_v56 = vand.u32 2147483648, %v695_v29  ;;  %v705_v59 = vand.u32 2147483647, %v695_v29  ;;  %vm701_vm13 = vweird.f32 %v695_v29 }
 0x1af   :  { %v674_v33 = vsub.f32 1.0, %v673_v31  ;;  %v866_v31 = vld [vmem:[#allocation16 + $0x98] sm:$0xff]  ;;  %884 = vmatpush.msrb.mxu3 %v858_v49 }
 0x1b0   :  { %v708_v62 = vor.u32 1.1754944e-38, %v707_v56  ;;  %vm706_vm15 = vcmp.eq.f32.partialorder %v705_v59, 8.507059e+37  ;;  %v850_v59 = vld [vmem:[#allocation16 + $0x18] sm:$0xff] }
 0x1b1   :  { %v675_v38 = vmul.f32 %v994_v28, %v674_v33  ;;  %v864_v33 = vld [vmem:[#allocation16 + $0x88] sm:$0xff]  ;;  %885 = vmatpush.msrb.mxu3 %v857_v40 }
 0x1b3   :  { %v676_v41 = vadd.f32 %v994_v28, %v675_v38 }
 0x1b4   :  { %v996_v43 = vpop.eup %995 }
 0x1b5   :  { %v697_v47 = vmul.f32 %v996_v43, %v695_v29  ;;  %v680_v48 = vsel %vm679_vm10, %v994_v28, %v676_v41  ;;  %vm702_vm12 = vweird.f32 %v996_v43  ;;  %v869_v28 = vld [vmem:[#allocation16 + $0xb0] sm:$0xff]  ;;  %v868_v29 = vld [vmem:[#allocation16 + $0xa8] sm:$0xff] }
 0x1b6   :  { %v685_v50 = vsel %vm682_vm11, %v684_v45, %v680_v48  ;;  %vm703_vm14 = vmor %vm701_vm13, %vm702_vm12  ;;  %v856_v41 = vld [vmem:[#allocation16 + $0x48] sm:$0xff] }
 0x1b7   :  { %v698_v53 = vsub.f32 1.0, %v697_v47  ;;  %v717_v55 = vmul.f32 %v716_v42, %v685_v50  ;;  %886 = vmatpush.msrb.mxu3 %v856_v41 }
 0x1b9   :  { %v718_v54 = vadd.f32 %v717_v55, %v713_v52  ;;  %v699_v58 = vmul.f32 %v996_v43, %v698_v53  ;;  %887 = vmatpush.msrb.mxu3 %v855_v44  ;;  %v852_v53 = vld [vmem:[#allocation16 + $0x28] sm:$0xff] }
 0x1bb   :  { %997 = vtanh.f32 %v718_v54  ;;  %v700_v61 = vadd.f32 %v996_v43, %v699_v58  ;;  %888 = vmatpush.msrb.mxu3 %v854_v46 }
 0x1bd   :  { %v704_v0 = vsel %vm703_vm14, %v996_v43, %v700_v61  ;;  %889 = vmatpush.msrb.mxu3 %v853_v51  ;;  %v848_v61 = vld [vmem:[#allocation16 + $0x8] sm:$0xff] }
 0x1be   :  { %v709_v1 = vsel %vm706_vm15, %v708_v62, %v704_v0  ;;  %v847_v62 = vld [vmem:[#allocation16] sm:$0xff]  ;;  %v879_v0 = vld [vmem:[%s1576_s12] sm:$0x1] }
 0x1bf   :  { %v720_v3 = vsub.f32 1.0, %v709_v1  ;;  %v722_v7 = vmul.f32 %v709_v1, %v1429_v14  ;;  %v878_v14 = vld [vmem:[#allocation16 + $0xf8] sm:$0xff]  ;;  %890 = vmatpush.msrb.mxu3 %v852_v53 }
 0x1c0   :  { %900 = vmatpush.msra.mxu2 %v878_v14 }
 0x1c1   :  { %v998_v5 = vpop.eup %997  ;;  %891 = vmatpush.msrb.mxu3 %v851_v57 }
 0x1c2   :  { %v721_v6 = vmul.f32 %v998_v5, %v720_v3  ;;  %901 = vmatpush.msra.mxu2 %v877_v15 }
 0x1c3   :  { %892 = vmatpush.msrb.mxu3 %v850_v59 }
 0x1c4   :  { %v1543_v8 = vadd.f32 %v722_v7, %v721_v6  ;;  %902 = vmatpush.msra.mxu2 %v876_v16 }
 0x1c5   :  { %893 = vmatpush.msrb.mxu3 %v849_v60 }
 0x1c6   :  { %757 = vmatmul.f32.vlgmr.msrb.gmra.mxu0 %v1543_v8  ;;  %724 = vst [vmem:[#allocation19 + $0x1] sm:$0x1] %v1543_v8  ;;  %903 = vmatpush.msra.mxu2 %v875_v22 }
 0x1c7   :  { %894 = vmatpush.msrb.mxu3 %v848_v61  ;;  %942 = dma.vmem_to_hbm [thread:$0]  %s938_s23, 32, %s940_s5, [#allocation20]  }
 0x1c8   :  { %904 = vmatpush.msra.mxu2 %v874_v23 }
 0x1c9   :  { %895 = vmatpush.msrb.mxu3 %v847_v62 }
 0x1ca   :  { %905 = vmatpush.msra.mxu2 %v873_v24 }
 0x1cc   :  { %906 = vmatpush.msra.mxu2 %v872_v25 }
 0x1ce   :  { %907 = vmatpush.msra.mxu2 %v871_v26 }
 0x1d0   :  { %908 = vmatpush.msra.mxu2 %v870_v27 }
 0x1d2   :  { %909 = vmatpush.msra.mxu2 %v869_v28 }
 0x1d4   :  { %910 = vmatpush.msra.mxu2 %v868_v29 }
 0x1d6   :  { %911 = vmatpush.msra.mxu2 %v867_v30 }
 0x1d8   :  { %912 = vmatpush.msra.mxu2 %v866_v31 }
 0x1da   :  { %913 = vmatpush.msra.mxu2 %v865_v32 }
 0x1dc   :  { %914 = vmatpush.msra.mxu2 %v864_v33 }
 0x1de   :  { %915 = vmatpush.msra.mxu2 %v863_v34 }
 0x243   :  { %v758_v10 = vpop.f32.mrf.mxu0 }
 0x244   :  { %793 = vmatmul.f32.vlgmr.msrb.gmra.mxu1 %v758_v10 }
 0x2c1   :  { %v794_v11 = vpop.f32.mrf.mxu1 }
 0x2c2   :  { %v798_v12 = vsel %vm797_vm0, %v794_v11, -inf }
 0x2c3   :  { %799 = vmax.xlane.f32.xlu0 %v798_v12 }
 0x336   :  { %v800_v17 = vpop.xlane.xlu0 %799 }
 0x337   :  { %v801_v18 = vsub.f32 %v794_v11, %v800_v17 }
 0x339   :  { %v802_v19 = vmul.f32 1.442695, %v801_v18 }
 0x33b   :  { %999 = vpow2.f32 %v802_v19 }
 0x341   :  { %v1550_v20 = vpop.eup %999 }
 0x342   :  { %v804_v21 = vsel %vm797_vm0, %v1550_v20, 0.0 }
 0x343   :  { %805 = vadd.xlane.f32.xlu0 %v804_v21 }
 0x3b6   :  { %v806_v38 = vpop.xlane.xlu0 %805 }
 0x3b7   :  { %1001 = vrcp.f32 %v806_v38  ;;  %v818_v47 = vand.u32 2147483648, %v806_v38  ;;  %v816_v50 = vand.u32 2147483647, %v806_v38  ;;  %vm812_vm2 = vweird.f32 %v806_v38 }
 0x3b9   :  { %v819_v55 = vor.u32 1.1754944e-38, %v818_v47  ;;  %vm817_vm4 = vcmp.eq.f32.partialorder %v816_v50, 8.507059e+37 }
 0x3bd   :  { %v1002_v42 = vpop.eup %1001 }
 0x3be   :  { %v808_v43 = vmul.f32 %v1002_v42, %v806_v38  ;;  %vm813_vm1 = vweird.f32 %v1002_v42 }
 0x3bf   :  { %vm814_vm3 = vmor %vm812_vm2, %vm813_vm1 }
 0x3c0   :  { %v809_v45 = vsub.f32 1.0, %v808_v43 }
 0x3c2   :  { %v810_v48 = vmul.f32 %v1002_v42, %v809_v45 }
 0x3c4   :  { %v811_v52 = vadd.f32 %v1002_v42, %v810_v48 }
 0x3c6   :  { %v815_v56 = vsel %vm814_vm3, %v1002_v42, %v811_v52 }
 0x3c7   :  { %v820_v54 = vsel %vm817_vm4, %v819_v55, %v815_v56 }
 0x3c8   :  { %v821_v58 = vmul.f32 %v1550_v20, %v820_v54 }
 0x3ca   :  { %964 = vmatmul.msk.f32.vlgmr.msrb.gmra.mxu2 %vm823_vm5, %v821_v58 }
 0x3d2   :  { %916 = vmatmul.f32.vlgmr.msra.gmra.mxu2 %v1543_v8 }
 0x44d   :  { %v844_v63 = vpop.f32.mrf.mxu2 }
 0x44e   :  { %896 = vmatmul.f32.vlgmr.msrb.gmra.mxu3 %v844_v63 }
 0x455   :  { %v917_v3 = vpop.f32.mrf.mxu2 }
 0x4d1   :  { %v897_v1 = vpop.f32.mrf.mxu3 }
 0x4d2   :  { %v898_v2 = vadd.f32 %v897_v1, %v879_v0 }
 0x4d4   :  { %v918_v4 = vadd.f32 %v917_v3, %v898_v2 }
 0x4d6   :  { %920 = vst [vmem:[#allocation18] sm:$0x1] %v918_v4 }
 0x4d7   :  { %931 = dma.vmem_to_hbm [thread:$0]  %s927_s19, 16, %s929_s0, [#allocation6]  }
 0x4d8   :  { %1253 = dma.done.wait [#allocation6], 16  }
 0x4d9   :  { %1254 = vsyncadd [#allocation6], 4294967280 }
 0x4da   :  { %1255 = dma.done.wait [#allocation20], 32  }
 0x4db   :  { %1256 = vsyncadd [#allocation20], 4294967264 }
 0x4dc   :  { %951 = vsyncpa [#allocation5], 1 }
 0x4dd   :  { %952 = vsyncpa [#allocation8], 1 }
 0x4de   :  { %953 = vsyncpa [#allocation11], 1 }
 0x4df   :  { %954 = vsyncpa [#allocation14], 1 }
 0x4e0   :  { %955 = vsyncpa [#allocation17], 1 }
 0x4e1   :  { %956 = vsyncpa [#allocation6], 1 }
 0x4e2   :  { %957 = vsyncpa [#allocation20], 1 }

</bundles_post_ra>
